<compile_context>
chip_gen: v7x
topology: tpu7x:2x2x1
jax: 0.10.0
libtpu: 0.0.40
codegen_flags: <defaults>
</compile_context>

<pallas_src>
import math

import jax
import jax.numpy as jnp
from jax.experimental import pallas as pl
from jax.experimental.pallas import tpu as pltpu

_LANE = 128              # lane tile (fast axis)
_SUB = 8                 # f32 sublane tile
_CHUNK_ROWS = 256        # rows per in-kernel accumulation chunk (mult of 8 & 16)
_MAX_BLOCK_ROWS = 4096   # 4096x128 f32 = 2 MiB per input block
_FAST_PATH_ELEMS = 64 * 1024


def _round_up(x, m):
  return (x + m - 1) // m * m


def vae_gaussian_kl_loss(mu, logvar):
  """Scalar KLD = -0.5 * sum(1 + logvar - mu^2 - exp(logvar))."""
  mu = jnp.asarray(mu)
  logvar = jnp.asarray(logvar)
  assert mu.shape == logvar.shape, "module is used with matching shapes"

  n = int(math.prod(mu.shape)) if mu.ndim else 1

  # --- Small-input fast path: fused XLA reduction beats any kernel launch.
  if n < _FAST_PATH_ELEMS:
    mu32 = mu.astype(jnp.float32)
    lv32 = logvar.astype(jnp.float32)
    return -0.5 * jnp.sum(1.0 + lv32 - mu32 * mu32 - jnp.exp(lv32))

  # --- Pallas path (large inputs). Lane-dense (rows, 128) view, native dtype.
  rows = pl.cdiv(n, _LANE)         # total valid rows
  n_lane_pad = rows * _LANE        # pad only to the next multiple of 128

  def prep(x):
    x = x.reshape(-1)              # free for contiguous arrays
    if n_lane_pad != n:
      # <=127 zero elements; (mu=0, logvar=0) contributes exactly 0 to the
      # sum, so this is exact. Only hit when n % 128 != 0 (rare for large
      # tensors); the common case streams with zero extra copies.
      x = jnp.pad(x, (0, n_lane_pad - n))
    return x.reshape(rows, _LANE)

  mu2d = prep(mu)
  lv2d = prep(logvar)

  # Block rows: multiple of the chunk size, capped, and chosen so that we get
  # at least 2 blocks (lets the "parallel" axis shard across v7x's 2 TCs).
  block_rows = min(_MAX_BLOCK_ROWS, _round_up(pl.cdiv(rows, 2), _CHUNK_ROWS))
  num_blocks = pl.cdiv(rows, block_rows)
  n_chunks = block_rows // _CHUNK_ROWS

  def kernel(mu_ref, lv_ref, out_ref):
    block_base = pl.program_id(0) * block_rows
    # Hoisted loop-invariant row iota (don't rebuild per chunk).
    row_iota = jax.lax.broadcasted_iota(jnp.int32, (_CHUNK_ROWS, _LANE), 0)

    def body(c, acc):
      r0 = pl.multiple_of(c * _CHUNK_ROWS, _CHUNK_ROWS)
      mu_c = mu_ref[pl.ds(r0, _CHUNK_ROWS), :].astype(jnp.float32)
      lv_c = lv_ref[pl.ds(r0, _CHUNK_ROWS), :].astype(jnp.float32)
      term = 1.0 + lv_c - mu_c * mu_c - jnp.exp(lv_c)
      # Mask rows past the true end of the array (last block may overhang the
      # (rows, 128) input; the overhang VMEM contents are garbage). Zeroes the
      # whole term, including the +1 constant.
      valid = (block_base + r0 + row_iota) < rows
      term = jnp.where(valid, term, 0.0)
      # Tile-aligned fold: (256,128) -> (32,8,128) -> sum over leading axis.
      return acc + jnp.sum(
          term.reshape(_CHUNK_ROWS // _SUB, _SUB, _LANE), axis=0)

    acc = jax.lax.fori_loop(0, n_chunks, body,
                            jnp.zeros((_SUB, _LANE), jnp.float32), unroll=2)
    out_ref[...] = -0.5 * acc      # lane-dense (8,128) unmasked store

  blk_in = pl.BlockSpec((block_rows, _LANE), lambda i: (i, 0))
  blk_out = pl.BlockSpec((_SUB, _LANE), lambda i: (i, 0))

  partials = pl.pallas_call(
      kernel,
      out_shape=jax.ShapeDtypeStruct((num_blocks * _SUB, _LANE), jnp.float32),
      grid_spec=pl.GridSpec(
          grid=(num_blocks,),
          in_specs=[blk_in, blk_in],
          out_specs=blk_out,
      ),
      compiler_params=pltpu.CompilerParams(
          dimension_semantics=("parallel",),
          vmem_limit_bytes=32 * 1024 * 1024),
  )(mu2d, lv2d)

  # Final tiny reduction of per-block partials (already scaled by -0.5).
  return jnp.sum(partials)


def _reference(mu, logvar):
  """Pure-JAX reference mirroring the PyTorch module (f32 accumulation)."""
  mu = jnp.asarray(mu, jnp.float32)
  logvar = jnp.asarray(logvar, jnp.float32)
  return -0.5 * jnp.sum(1.0 + logvar - mu * mu - jnp.exp(logvar))


if __name__ == "__main__":
  # VaeGaussianKLLoss has no parameters; inputs are (batch, latent_dim).
  key = jax.random.PRNGKey(0)

  cases = [
      # (name, shape, dtype) -- first is the module-typical tiny case
      # (fast path); the others exercise the Pallas path: multi-block with
      # an overhanging (masked) last block, and a ragged bf16 case.
      ("tiny (2,32) f32", (2, 32), jnp.float32),
      ("pallas (1000,128) f32", (1000, 128), jnp.float32),
      ("pallas ragged (999,80) bf16", (999, 80), jnp.bfloat16),
  ]

  for name, shape, dtype in cases:
    key, k1, k2 = jax.random.split(key, 3)
    mu = jax.random.normal(k1, shape, dtype=jnp.float32).astype(dtype)
    logvar = (0.5 * jax.random.normal(k2, shape, dtype=jnp.float32)).astype(dtype)

    kld = jax.block_until_ready(vae_gaussian_kl_loss(mu, logvar))
    ref = _reference(mu, logvar)

    assert kld.shape == () and kld.dtype == jnp.float32, name
    assert jnp.allclose(kld, ref, rtol=1e-4, atol=1e-3), (
        f"{name}: kernel={kld}, ref={ref}, abs err={jnp.abs(kld - ref)}")

  print("KERNEL_OK")
</pallas_src>

<mosaic_0001>
module attributes {stable_mosaic.version = 11 : i64} {
  func.func @kernel(%arg0: i32, %arg1: memref<512x128xf32, #tpu.memory_space<vmem>>, %arg2: memref<512x128xf32, #tpu.memory_space<vmem>>, %arg3: memref<8x128xf32, #tpu.memory_space<vmem>>) attributes {dimension_semantics = [#tpu.dimension_semantics<parallel>], iteration_bounds = array<i64: 2>, scalar_prefetch = 0 : i64, scratch_operands = 0 : i64, tpu.core_type = #tpu.core_type<tc>, window_params = [{transform_indices = @transform_0, window_bounds = array<i64: 512, 128>}, {transform_indices = @transform_1, window_bounds = array<i64: 512, 128>}, {transform_indices = @transform_2, window_bounds = array<i64: 8, 128>}]} {
    %c512_i32 = arith.constant 512 : i32
    %0 = arith.muli %arg0, %c512_i32 : i32
    %1 = tpu.iota {dimensions = array<i32: 0>} : vector<256x128xi32>
    %cst = arith.constant 0.000000e+00 : f32
    %2 = vector.broadcast %cst : f32 to vector<8x128xf32>
    %c0_i32 = arith.constant 0 : i32
    %c256_i32 = arith.constant 256 : i32
    %3 = arith.muli %c0_i32, %c256_i32 : i32
    %4 = tpu.assume_multiple %3, 256 : i32
    %5 = arith.index_cast %4 : i32 to index
    %c0 = arith.constant 0 : index
    %6 = vector.load %arg1[%5, %c0] : memref<512x128xf32, #tpu.memory_space<vmem>>, vector<256x128xf32>
    %7 = arith.index_cast %4 : i32 to index
    %c0_0 = arith.constant 0 : index
    %8 = vector.load %arg2[%7, %c0_0] : memref<512x128xf32, #tpu.memory_space<vmem>>, vector<256x128xf32>
    %cst_1 = arith.constant 1.000000e+00 : f32
    %9 = vector.broadcast %cst_1 : f32 to vector<256x128xf32>
    %10 = arith.addf %9, %8 : vector<256x128xf32>
    %11 = arith.mulf %6, %6 : vector<256x128xf32>
    %12 = arith.subf %10, %11 : vector<256x128xf32>
    %13 = math.exp %8 : vector<256x128xf32>
    %14 = arith.subf %12, %13 : vector<256x128xf32>
    %15 = arith.addi %0, %4 : i32
    %16 = vector.broadcast %15 : i32 to vector<256x128xi32>
    %17 = arith.addi %16, %1 : vector<256x128xi32>
    %c1000_i32 = arith.constant 1000 : i32
    %18 = vector.broadcast %c1000_i32 : i32 to vector<256x128xi32>
    %19 = arith.cmpi slt, %17, %18 : vector<256x128xi32>
    %cst_2 = arith.constant 0.000000e+00 : f32
    %20 = vector.broadcast %cst_2 : f32 to vector<256x128xf32>
    %21 = arith.select %19, %14, %20 : vector<256x128xi1>, vector<256x128xf32>
    %22 = vector.shape_cast %21 : vector<256x128xf32> to vector<32x8x128xf32>
    %cst_3 = arith.constant dense<0.000000e+00> : vector<8x128xf32>
    %23 = vector.multi_reduction <add>, %22, %cst_3 [0] : vector<32x8x128xf32> to vector<8x128xf32>
    %24 = arith.addf %2, %23 : vector<8x128xf32>
    %c1_i32 = arith.constant 1 : i32
    %c256_i32_4 = arith.constant 256 : i32
    %25 = arith.muli %c1_i32, %c256_i32_4 : i32
    %26 = tpu.assume_multiple %25, 256 : i32
    %27 = arith.index_cast %26 : i32 to index
    %c0_5 = arith.constant 0 : index
    %28 = vector.load %arg1[%27, %c0_5] : memref<512x128xf32, #tpu.memory_space<vmem>>, vector<256x128xf32>
    %29 = arith.index_cast %26 : i32 to index
    %c0_6 = arith.constant 0 : index
    %30 = vector.load %arg2[%29, %c0_6] : memref<512x128xf32, #tpu.memory_space<vmem>>, vector<256x128xf32>
    %cst_7 = arith.constant 1.000000e+00 : f32
    %31 = vector.broadcast %cst_7 : f32 to vector<256x128xf32>
    %32 = arith.addf %31, %30 : vector<256x128xf32>
    %33 = arith.mulf %28, %28 : vector<256x128xf32>
    %34 = arith.subf %32, %33 : vector<256x128xf32>
    %35 = math.exp %30 : vector<256x128xf32>
    %36 = arith.subf %34, %35 : vector<256x128xf32>
    %37 = arith.addi %0, %26 : i32
    %38 = vector.broadcast %37 : i32 to vector<256x128xi32>
    %39 = arith.addi %38, %1 : vector<256x128xi32>
    %c1000_i32_8 = arith.constant 1000 : i32
    %40 = vector.broadcast %c1000_i32_8 : i32 to vector<256x128xi32>
    %41 = arith.cmpi slt, %39, %40 : vector<256x128xi32>
    %cst_9 = arith.constant 0.000000e+00 : f32
    %42 = vector.broadcast %cst_9 : f32 to vector<256x128xf32>
    %43 = arith.select %41, %36, %42 : vector<256x128xi1>, vector<256x128xf32>
    %44 = vector.shape_cast %43 : vector<256x128xf32> to vector<32x8x128xf32>
    %cst_10 = arith.constant dense<0.000000e+00> : vector<8x128xf32>
    %45 = vector.multi_reduction <add>, %44, %cst_10 [0] : vector<32x8x128xf32> to vector<8x128xf32>
    %46 = arith.addf %24, %45 : vector<8x128xf32>
    %c2_i32 = arith.constant 2 : i32
    %cst_11 = arith.constant -5.000000e-01 : f32
    %47 = vector.broadcast %cst_11 : f32 to vector<8x128xf32>
    %48 = arith.mulf %47, %46 : vector<8x128xf32>
    %c0_12 = arith.constant 0 : index
    %c0_13 = arith.constant 0 : index
    %49 = vector.load %arg3[%c0_12, %c0_13] : memref<8x128xf32, #tpu.memory_space<vmem>>, vector<8x128xf32>
    tpu.vector_store %arg3[%c0_12, %c0_13], %48 {strides = array<i32>} : memref<8x128xf32, #tpu.memory_space<vmem>>, vector<8x128xf32>,
    return
  }
  func.func @transform_0(%arg0: i32) -> (i32, i32) {
    %c0_i32 = arith.constant 0 : i32
    %c0_i32_0 = arith.constant 0 : i32
    return %arg0, %c0_i32 : i32, i32
  }
  func.func @transform_1(%arg0: i32) -> (i32, i32) {
    %c0_i32 = arith.constant 0 : i32
    %c0_i32_0 = arith.constant 0 : i32
    return %arg0, %c0_i32 : i32, i32
  }
  func.func @transform_2(%arg0: i32) -> (i32, i32) {
    %c0_i32 = arith.constant 0 : i32
    %c0_i32_0 = arith.constant 0 : i32
    return %arg0, %c0_i32 : i32, i32
  }
}

</mosaic_0001>

<bundles_post_ra>
// kernel: tpu_custom_call.1
= control target key start
LH: loop header
LB: loop body
LE: loop exit
PB: predicated region body
PF: predicated region fallthrough
CT: control target
= control target key end

     0   :  { %7 = vsyncpa [#allocation3], 0  ;;  %s3151_s0 = inlined_call_operand.hbm [shape: f32[1000,128], index: 0, kind: input, shape index: {}]   ;;  %s3152_s1 = inlined_call_operand.hbm [shape: f32[1000,128], index: 1, kind: input, shape index: {}]   ;;  %s3153_s2 = inlined_call_operand.hbm [shape: f32[16,128], index: 2, kind: output, shape index: {}]  }
   0x1   :  { %9 = vsyncpa [#allocation3 + $0x1], 0 }
   0x2   :  { %10 = vsyncpa [#allocation6], 0 }
   0x3   :  { %12 = vsyncpa [#allocation6 + $0x1], 0 }
   0x4   :  { %13 = vsyncpa [#allocation4], 0 }
   0x5   :  { %15 = vsyncpa [#allocation4 + $0x1], 0  ;;  %s1556_s9 = smov 0   ;;  %s1558_s10 = smov 0  }
   0x6   :  { %s1560_s11 = smov 0   ;;  %s1562_s12 = smov 0  }
   0x7 LB: > { %s1577_s13 = sadd.s32 4294967295, %s1532_s12   ;;  %s1141_s14 = sadd.s32 4294967294, %s1532_s12   ;;  %s1532_s12 = sphi %s1562_s12, %s3714_s12   ;;  %s1528_s11 = sphi %s1560_s11, %s3713_s11   ;;  %s1524_s10 = sphi %s1558_s10, %s3712_s10   ;;  %s1520_s9 = sphi %s1556_s9, %s3711_s9  }
   0x8   : > { %s1581_s15 = sadd.s32 1, %s1532_s12   ;;  %s28_s16 = sadd.s32 1, %s1528_s11 }
   0x9   : > { %s25_s17 = ssub.s32 %s1532_s12, %s1581_s15  ;;  %p35_p0 = scmp.ne.s32.totalorder %s1528_s11, %s1524_s10 }
   0xa   : > { %p26_p1 = scmp.eq.s32.totalorder %s25_s17, 0  ;;  %p36_p2 = scmp.eq.s32.totalorder %s1532_s12, 0 }
   0xb   : > { %p41_p3 = scmp.ne.s32.totalorder %s1524_s10, %s1520_s9  ;;  %p42_p4 = scmp.eq.s32.totalorder %s1577_s13, 0 }
   0xc   : > { %s1593_s18 = scalar_select %p26_p1, %s1528_s11, %s28_s16  }
   0xd   : > { %p1595_p5 = por %p36_p2, %p35_p0  ;;  %p1599_p6 = por %p42_p4, %p41_p3 }
   0xe   : > { %p91_p7 = scmp.eq.s32.totalorder %s1577_s13, 1  ;;  %p97_p8 = scmp.eq.s32.totalorder %s1141_s14, 1 }
   0xf   : > { %p3154_p11 = scmp.ge.s32.totalorder %s1532_s12, 2 }
  0x10   : > { %p1604_p9 = por %p91_p7, %p35_p0  ;;  %p1608_p10 = por %p97_p8, %p41_p3 }
  0x11   : > { %113 = sbr.rel (%p3154_p11) target bundleno = 94 (0x5e), region = 16 }
  0x12   : > { %s3295_s21 = scalar_select %p1604_p9, 1, 0 }
  0x13   : > { %s3296_s22 = scalar_select %p1608_p10, 1, 0 }
  0x18   : > { %116 = sbr.rel (!%p1595_p5) target bundleno = 59 (0x3b), region = 20  ;;  %s117_s23 = sand.u32 (%p1595_p5), 1, %s1528_s11  }
  0x19   : > { %s1145_s24 = sshll.u32 (%p1595_p5), %s1532_s12, 6  ;;  %s1144_s25 = sshll.u32 (%p1595_p5), %s117_s23, 9 }
  0x1a   : > { %s123_s26 = ssub.s32 (%p1595_p5), 125, %s1145_s24  ;;  %s1622_s29 = scalar_lea.sflag (%p1595_p5), [#allocation3], %s117_s23 }
  0x1b   : > { %p124_p12 = scmp.lt.s32.totalorder (%p1595_p5), %s123_s26, 64  ;;  %s121_s30 = scalar_lea.vmem (%p1595_p5), [#allocation2], %s1144_s25 }
  0x1f   : > { %s3716_s26 = smov (!%p124_p12, %s123_s26), 64 }
  0x20   : > { %s1619_s27 = sshll.u32 %s3716_s26, 7 }
  0x21   : > { %s128_s28 = ssub.s32 8192, %s1619_s27 }
  0x22   : > { %129 = vsyncadd %s1622_s29, %s128_s28  ;;  %p1147_p13 = scmp.ne.s32.totalorder %s1619_s27, 0  ;;  %s1231_s3 = sshll.u32 %s1532_s12, 13 }
  0x23   : > { %s1630_s6 = scalar_lea.hbm %s3151_s0, %s1231_s3  ;;  %s134_s7 = sshll.u32 %s121_s30, 4  ;;  %s1632_s7 = int_to_ptr.vmem [resolvable:$true] %s134_s7 }
  0x24   : > { %s1406_s8 = scalar_lea.hbm %s1630_s6, %s1619_s27  ;;  %s1410_s17 = scalar_lea.hbm %s3151_s0, 16000 }
  0x25   : > { %p1407_p0 = scmp.ne.s32.totalorder %s1630_s6, %s1406_s8  ;;  %p1411_p3 = scmp.lt.u32.totalorder %s1630_s6, %s3151_s0 }
  0x26   : > { %p1412_p4 = scmp.lt.u32.totalorder %s1410_s17, %s1406_s8  ;;  %p1414_p8 = scmp.lt.u32.totalorder %s1406_s8, %s1630_s6 }
  0x27   : > { %p1408_p1 = pnand %p1407_p0, %p1147_p13 }
  0x28   : > { %p1413_p7 = por %p1412_p4, %p1411_p3 }
  0x29   : > { %p1409_p2 = pneg %p1408_p1 }
  0x2a   : > { %p1415_p12 = por %p1414_p8, %p1413_p7 }
  0x2c   : > { %p1416_p11 = pnand %p1415_p12, %p1409_p2 }
  0x2e   : > { %1419 = shalt.err (!%p1416_p11)
}
  0x2f   : > { %s1420_s25 = scalar_lea.vmem %s1632_s7, %s1619_s27  ;;  %s1534_s26 = smov [#allocation2]  }
  0x30   : > { %p1421_p0 = scmp.ne.s32.totalorder %s1632_s7, %s1420_s25  ;;  %s1424_s28 = sshll.u32 %s1534_s26, 4  ;;  %s1425_s28 = int_to_ptr.vmem [resolvable:$false] %s1424_s28 }
  0x31   : > { %s1426_s30 = scalar_lea.vmem %s1425_s28, 16384  ;;  %p1427_p9 = scmp.lt.s32.totalorder %s1632_s7, %s1425_s28 }
  0x32   : > { %p1422_p1 = pnand %p1421_p0, %p1147_p13  ;;  %p1428_p3 = scmp.lt.s32.totalorder %s1426_s30, %s1420_s25 }
  0x34   : > { %p1423_p10 = pneg %p1422_p1  ;;  %p1429_p4 = por %p1428_p3, %p1427_p9 }
  0x36   : > { %p1430_p7 = pnand %p1429_p4, %p1423_p10 }
  0x38   : > { %1433 = shalt.err (!%p1430_p7)
}
  0x39   : > { %s1535_s3 = smov 128   ;;  %s1536_s4 = smov 8  }
  0x3a   : > { %140 = dma.hbm_to_vmem [thread:$0]  (%p1147_p13), %s1630_s6, %s1619_s27, %s1632_s7, %s1622_s29, %s1535_s3, %s1535_s3, %s1536_s4  }
  0x3b PF: > { %143 = sbr.rel (!%p1595_p5) target bundleno = 94 (0x5e), region = 24  ;;  %s144_s5 = sand.u32 (%p1595_p5), 1, %s1528_s11  }
  0x3c   : > { %s1152_s8 = sshll.u32 (%p1595_p5), %s1532_s12, 6  ;;  %s1151_s14 = sshll.u32 (%p1595_p5), %s144_s5, 9 }
  0x3d   : > { %s150_s16 = ssub.s32 (%p1595_p5), 125, %s1152_s8  ;;  %s1666_s24 = scalar_lea.sflag (%p1595_p5), [#allocation6], %s144_s5 }
  0x3e   : > { %p151_p9 = scmp.lt.s32.totalorder (%p1595_p5), %s150_s16, 64  ;;  %s148_s27 = scalar_lea.vmem (%p1595_p5), [#allocation5], %s1151_s14 }
  0x42   : > { %s3718_s16 = smov (!%p151_p9, %s150_s16), 64 }
  0x43   : > { %s1663_s17 = sshll.u32 %s3718_s16, 7 }
  0x44   : > { %s155_s23 = ssub.s32 8192, %s1663_s17 }
  0x45   : > { %156 = vsyncadd %s1666_s24, %s155_s23  ;;  %p1154_p5 = scmp.ne.s32.totalorder %s1663_s17, 0  ;;  %s1232_s19 = sshll.u32 %s1532_s12, 13 }
  0x46   : > { %s1674_s7 = scalar_lea.hbm %s3152_s1, %s1232_s19  ;;  %s161_s25 = sshll.u32 %s148_s27, 4  ;;  %s1676_s25 = int_to_ptr.vmem [resolvable:$true] %s161_s25 }
  0x47   : > { %s1434_s26 = scalar_lea.hbm %s1674_s7, %s1663_s17  ;;  %s1438_s3 = scalar_lea.hbm %s3152_s1, 16000 }
  0x48   : > { %p1435_p10 = scmp.ne.s32.totalorder %s1674_s7, %s1434_s26  ;;  %p1439_p2 = scmp.lt.u32.totalorder %s1674_s7, %s3152_s1 }
  0x49   : > { %p1440_p8 = scmp.lt.u32.totalorder %s1438_s3, %s1434_s26  ;;  %p1442_p0 = scmp.lt.u32.totalorder %s1434_s26, %s1674_s7 }
  0x4a   : > { %p1436_p11 = pnand %p1435_p10, %p1154_p5 }
  0x4b   : > { %p1441_p12 = por %p1440_p8, %p1439_p2 }
  0x4c   : > { %p1437_p13 = pneg %p1436_p11 }
  0x4d   : > { %p1443_p1 = por %p1442_p0, %p1441_p12 }
  0x4f   : > { %p1444_p3 = pnand %p1443_p1, %p1437_p13 }
  0x51   : > { %1447 = shalt.err (!%p1444_p3)
}
  0x52   : > { %s1448_s8 = scalar_lea.vmem %s1676_s25, %s1663_s17  ;;  %s1537_s14 = smov [#allocation5]  }
  0x53   : > { %p1449_p4 = scmp.ne.s32.totalorder %s1676_s25, %s1448_s8  ;;  %s1452_s16 = sshll.u32 %s1537_s14, 4  ;;  %s1453_s16 = int_to_ptr.vmem [resolvable:$false] %s1452_s16 }
  0x54   : > { %s1454_s23 = scalar_lea.vmem %s1453_s16, 16384  ;;  %p1455_p10 = scmp.lt.s32.totalorder %s1676_s25, %s1453_s16 }
  0x55   : > { %p1450_p7 = pnand %p1449_p4, %p1154_p5  ;;  %p1456_p11 = scmp.lt.s32.totalorder %s1454_s23, %s1448_s8 }
  0x57   : > { %p1451_p9 = pneg %p1450_p7  ;;  %p1457_p2 = por %p1456_p11, %p1455_p10 }
  0x59   : > { %p1458_p8 = pnand %p1457_p2, %p1451_p9 }
  0x5b   : > { %1461 = shalt.err (!%p1458_p8)
}
  0x5c   : > { %s1538_s27 = smov 128   ;;  %s1539_s19 = smov 8  }
  0x5d   : > { %167 = dma.hbm_to_vmem [thread:$0]  (%p1154_p5), %s1674_s7, %s1663_s17, %s1676_s25, %s1666_s24, %s1538_s27, %s1538_s27, %s1539_s19  }
  0x5e PF: > { %p1158_p13 = scmp.ge.s32.totalorder %s1532_s12, 1  ;;  %p169_p12 = scmp.lt.s32.totalorder %s1532_s12, 3 }
  0x60   : > { %p170_p0 = pnand %p1158_p13, %p169_p12 }
  0x62   : > { %173 = sbr.rel (%p170_p0) target bundleno = 337 (0x151), region = 28 }
  0x69   : > { %s1706_s29 = sand.u32 1, %s1524_s10  }
  0x6a   : > { %s1159_s6 = sshll.u32 %s1706_s29, 9  ;;  %s176_s26 = scalar_lea.sflag [#allocation3], %s1706_s29 }
  0x6b   : > { %s1710_s28 = scalar_lea.vmem [#allocation2], %s1159_s6 }
  0x6c   : > { %1507 = dma.done.wait (%p1599_p6), %s176_s26, 8192  }
  0x6d   : > { %1509 = vsyncadd (%p1599_p6), %s176_s26, 4294959104  ;;  %s185_s17 = scalar_lea.sflag [#allocation6], %s1706_s29  ;;  %s1717_s24 = scalar_lea.vmem [#allocation5], %s1159_s6 }
  0x6e   : > { %1511 = dma.done.wait (%p1599_p6), %s185_s17, 8192  }
  0x6f   : > { %1513 = vsyncadd (%p1599_p6), %s185_s17, 4294959104  ;;  %v225_v0 = vlaneseq  ;;  %s1162_s7 = sshll.u32 %s1577_s13, 9  ;;  %v258_v20 = vld [vmem:[%s1710_s28] sm:$0xff]  ;;  %v259_v21 = vld [vmem:[%s1710_s28 + $0x8] sm:$0xff]  ;;  %s1161_s25 = sshll.u32 %s1706_s29, 3 }
  0x70   : > { %s1773_s20 = sadd.s32 256, %s1162_s7  ;;  %v260_v22 = vld [vmem:[%s1710_s28 + $0x10] sm:$0xff]  ;;  %v261_v26 = vld [vmem:[%s1710_s28 + $0x18] sm:$0xff]  ;;  %v262_v27 = vld [vmem:[%s1710_s28 + $0x20] sm:$0xff]  ;;  %v1825_v41 = vstv %s1162_s7  ;;  %v1848_v53 = vmul.f32 %v258_v20, %v258_v20  ;;  %v1850_v54 = vmul.f32 %v259_v21, %v259_v21  ;;  %s1228_s30 = sshll.u32 %s1577_s13, 7 }
  0x71   : > { %v1723_v1 = vshrl.u32 %v225_v0, 7  ;;  %v263_v28 = vld [vmem:[%s1710_s28 + $0x28] sm:$0xff]  ;;  %v264_v32 = vld [vmem:[%s1710_s28 + $0x30] sm:$0xff]  ;;  %v265_v33 = vld [vmem:[%s1710_s28 + $0x38] sm:$0xff]  ;;  %3325 = vst [vmem:[#allocation39_spill] sm:$0xff] %v1825_v41  ;;  %v1840_v48 = vstv %s1773_s20  ;;  %v1852_v55 = vmul.f32 %v260_v22, %v260_v22  ;;  %v1857_v59 = vmul.f32 %v261_v26, %v261_v26  ;;  %s213_s3 = scalar_lea.vmem [#allocation7], %s1161_s25  ;;  %s3107_s14 = scalar_lea.hbm %s3153_s2, %s1228_s30 }
  0x72   : > { %v266_v34 = vld [vmem:[%s1710_s28 + $0x40] sm:$0xff]  ;;  %v267_v38 = vld [vmem:[%s1710_s28 + $0x48] sm:$0xff]  ;;  %v268_v39 = vld [vmem:[%s1710_s28 + $0x50] sm:$0xff]  ;;  %3329 = vst [vmem:[#allocation43_spill] sm:$0xff] %v1840_v48  ;;  %v1859_v60 = vmul.f32 %v262_v27, %v262_v27  ;;  %v1861_v61 = vmul.f32 %v263_v28, %v263_v28  ;;  %v1863_v62 = vmul.f32 %v264_v32, %v264_v32  ;;  %v1868_v21 = vmul.f32 %v265_v33, %v265_v33  ;;  %s1048_s4 = sshll.u32 %s213_s3, 4  ;;  %s1035_s16 = scalar_lea.sflag [#allocation4], %s1706_s29  ;;  %s3109_s4 = int_to_ptr.vmem [resolvable:$true] %s1048_s4 }
  0x73   : > { %3297 = vst [vmem:[#allocation11_spill] sm:$0xff] %v1723_v1  ;;  %v1727_v2 = vadd.s32 8, %v1723_v1  ;;  %v1730_v3 = vadd.s32 16, %v1723_v1  ;;  %v1733_v4 = vadd.s32 24, %v1723_v1  ;;  %v1736_v5 = vadd.s32 32, %v1723_v1  ;;  %v269_v40 = vld [vmem:[%s1710_s28 + $0x58] sm:$0xff] }
  0x74   : > { %v1739_v6 = vadd.s32 40, %v1723_v1  ;;  %v1742_v7 = vadd.s32 48, %v1723_v1  ;;  %v1745_v8 = vadd.s32 56, %v1723_v1  ;;  %v1748_v9 = vadd.s32 64, %v1723_v1  ;;  %v270_v45 = vld [vmem:[%s1710_s28 + $0x60] sm:$0xff]  ;;  %v271_v46 = vld [vmem:[%s1710_s28 + $0x68] sm:$0xff] }
  0x75   : > { %3298 = vst [vmem:[#allocation12_spill] sm:$0xff] %v1727_v2  ;;  %3299 = vst [vmem:[#allocation13_spill] sm:$0xff] %v1730_v3  ;;  %v1751_v10 = vadd.s32 72, %v1723_v1  ;;  %v1754_v11 = vadd.s32 80, %v1723_v1  ;;  %v1757_v12 = vadd.s32 88, %v1723_v1  ;;  %v1760_v13 = vadd.s32 96, %v1723_v1 }
  0x76   : > { %3300 = vst [vmem:[#allocation14_spill] sm:$0xff] %v1733_v4  ;;  %3301 = vst [vmem:[#allocation15_spill] sm:$0xff] %v1736_v5  ;;  %v1763_v14 = vadd.s32 104, %v1723_v1  ;;  %v1766_v15 = vadd.s32 112, %v1723_v1  ;;  %v1769_v16 = vadd.s32 120, %v1723_v1  ;;  %v1776_v17 = vadd.s32 128, %v1723_v1 }
  0x77   : > { %3302 = vst [vmem:[#allocation16_spill] sm:$0xff] %v1739_v6  ;;  %3303 = vst [vmem:[#allocation17_spill] sm:$0xff] %v1742_v7  ;;  %v1779_v18 = vadd.s32 136, %v1723_v1  ;;  %v1782_v19 = vadd.s32 144, %v1723_v1  ;;  %v1788_v23 = vadd.s32 152, %v1723_v1  ;;  %v1791_v24 = vadd.s32 160, %v1723_v1 }
  0x78   : > { %3304 = vst [vmem:[#allocation18_spill] sm:$0xff] %v1745_v8  ;;  %3305 = vst [vmem:[#allocation19_spill] sm:$0xff] %v1748_v9  ;;  %v1794_v25 = vadd.s32 168, %v1723_v1  ;;  %v1800_v29 = vadd.s32 176, %v1723_v1  ;;  %v1803_v30 = vadd.s32 184, %v1723_v1  ;;  %v1806_v31 = vadd.s32 192, %v1723_v1 }
  0x79   : > { %3306 = vst [vmem:[#allocation20_spill] sm:$0xff] %v1751_v10  ;;  %3307 = vst [vmem:[#allocation21_spill] sm:$0xff] %v1754_v11  ;;  %v1812_v35 = vadd.s32 200, %v1723_v1  ;;  %v1815_v36 = vadd.s32 208, %v1723_v1  ;;  %v1818_v37 = vadd.s32 216, %v1723_v1  ;;  %v1828_v42 = vadd.s32 224, %v1723_v1 }
  0x7a   : > { %3308 = vst [vmem:[#allocation22_spill] sm:$0xff] %v1757_v12  ;;  %3309 = vst [vmem:[#allocation23_spill] sm:$0xff] %v1760_v13  ;;  %v1831_v43 = vadd.s32 232, %v1723_v1  ;;  %v1834_v44 = vadd.s32 240, %v1723_v1  ;;  %v272_v47 = vld [vmem:[%s1710_s28 + $0x70] sm:$0xff]  ;;  %v1843_v49 = vadd.s32 248, %v1723_v1  ;;  %v1870_v22 = vmul.f32 %v266_v34, %v266_v34 }
  0x7b   : > { %3310 = vst [vmem:[#allocation24_spill] sm:$0xff] %v1763_v14  ;;  %3311 = vst [vmem:[#allocation25_spill] sm:$0xff] %v1766_v15  ;;  %v273_v50 = vld [vmem:[%s1710_s28 + $0x78] sm:$0xff]  ;;  %v274_v51 = vld [vmem:[%s1710_s28 + $0x80] sm:$0xff]  ;;  %v1872_v48 = vmul.f32 %v267_v38, %v267_v38  ;;  %v1874_v26 = vmul.f32 %v268_v39, %v268_v39  ;;  %v1879_v32 = vmul.f32 %v269_v40, %v269_v40  ;;  %s1462_s23 = scalar_lea.vmem %s3109_s4, 128  ;;  %p3708_p5 = scmp.ne.s32.totalorder %s3295_s21, 0 }
  0x7c   : > { %3312 = vst [vmem:[#allocation26_spill] sm:$0xff] %v1769_v16  ;;  %3313 = vst [vmem:[#allocation27_spill] sm:$0xff] %v1776_v17  ;;  %v275_v52 = vld [vmem:[%s1710_s28 + $0x88] sm:$0xff]  ;;  %v276_v56 = vld [vmem:[%s1710_s28 + $0x90] sm:$0xff]  ;;  %v1885_v33 = vmul.f32 %v272_v47, %v272_v47  ;;  %v1892_v39 = vmul.f32 %v274_v51, %v274_v51  ;;  %p1463_p6 = scmp.ne.s32.totalorder %s3109_s4, %s1462_s23  ;;  %s1540_s13 = smov [#allocation7]  }
  0x7d   : > { %3314 = vst [vmem:[#allocation28_spill] sm:$0xff] %v1779_v18  ;;  %3315 = vst [vmem:[#allocation29_spill] sm:$0xff] %v1782_v19  ;;  %v277_v57 = vld [vmem:[%s1710_s28 + $0x98] sm:$0xff]  ;;  %v278_v58 = vld [vmem:[%s1710_s28 + $0xa0] sm:$0xff]  ;;  %s1466_s27 = sshll.u32 %s1540_s13, 4  ;;  %s1467_s27 = int_to_ptr.vmem [resolvable:$false] %s1466_s27 }
  0x7e   : > { %3316 = vst [vmem:[#allocation30_spill] sm:$0xff] %v1788_v23  ;;  %3317 = vst [vmem:[#allocation31_spill] sm:$0xff] %v1791_v24  ;;  %v279_v63 = vld [vmem:[%s1710_s28 + $0xa8] sm:$0xff]  ;;  %v280_v0 = vld [vmem:[%s1710_s28 + $0xb0] sm:$0xff]  ;;  %v1902_v47 = vmul.f32 %v278_v58, %v278_v58  ;;  %p1464_p1 = pnand %p1463_p6, %p3708_p5  ;;  %s1468_s19 = scalar_lea.vmem %s1467_s27, 256 }
  0x7f   : > { %3318 = vst [vmem:[#allocation32_spill] sm:$0xff] %v1794_v25  ;;  %3319 = vst [vmem:[#allocation33_spill] sm:$0xff] %v1800_v29  ;;  %v281_v20 = vld [vmem:[%s1710_s28 + $0xb8] sm:$0xff]  ;;  %v282_v27 = vld [vmem:[%s1710_s28 + $0xc0] sm:$0xff]  ;;  %p1469_p4 = scmp.lt.s32.totalorder %s3109_s4, %s1467_s27  ;;  %p1470_p7 = scmp.lt.s32.totalorder %s1468_s19, %s1462_s23 }
  0x80   : > { %3320 = vst [vmem:[#allocation34_spill] sm:$0xff] %v1803_v30  ;;  %3321 = vst [vmem:[#allocation35_spill] sm:$0xff] %v1806_v31  ;;  %v283_v28 = vld [vmem:[%s1710_s28 + $0xc8] sm:$0xff]  ;;  %v285_v34 = vld [vmem:[%s1710_s28 + $0xd8] sm:$0xff]  ;;  %v1904_v31 = vmul.f32 %v279_v63, %v279_v63  ;;  %v1906_v30 = vmul.f32 %v280_v0, %v280_v0  ;;  %v1911_v51 = vmul.f32 %v281_v20, %v281_v20  ;;  %p1465_p3 = pneg %p1464_p1 }
  0x81   : > { %3322 = vst [vmem:[#allocation36_spill] sm:$0xff] %v1812_v35  ;;  %3323 = vst [vmem:[#allocation37_spill] sm:$0xff] %v1815_v36  ;;  %v287_v38 = vld [vmem:[%s1710_s28 + $0xe8] sm:$0xff]  ;;  %v1894_v36 = vmul.f32 %v275_v52, %v275_v52  ;;  %v1896_v35 = vmul.f32 %v276_v56, %v276_v56  ;;  %v288_v40 = vld [vmem:[%s1710_s28 + $0xf0] sm:$0xff]  ;;  %v1913_v52 = vmul.f32 %v282_v27, %v282_v27  ;;  %p1471_p9 = por %p1470_p7, %p1469_p4 }
  0x82   : > { %3324 = vst [vmem:[#allocation38_spill] sm:$0xff] %v1818_v37  ;;  %3326 = vst [vmem:[#allocation40_spill] sm:$0xff] %v1828_v42  ;;  %v286_v42 = vld [vmem:[%s1710_s28 + $0xe0] sm:$0xff]  ;;  %v1890_v37 = vmul.f32 %v273_v50, %v273_v50  ;;  %v1915_v56 = vmul.f32 %v283_v28, %v283_v28  ;;  %v1920_v29 = vld [vmem:[%s1717_s24 + $0x8] sm:$0xff]  ;;  %v1925_v63 = vmul.f32 %v285_v34, %v285_v34 }
  0x83   : > { %3327 = vst [vmem:[#allocation41_spill] sm:$0xff] %v1831_v43  ;;  %3328 = vst [vmem:[#allocation42_spill] sm:$0xff] %v1834_v44  ;;  %v1881_v44 = vmul.f32 %v270_v45, %v270_v45  ;;  %v1883_v43 = vmul.f32 %v271_v46, %v271_v46  ;;  %v289_v45 = vld [vmem:[%s1710_s28 + $0xf8] sm:$0xff]  ;;  %v1900_v46 = vmul.f32 %v277_v57, %v277_v57  ;;  %v1909_v50 = vld [vmem:[%s1717_s24] sm:$0xff]  ;;  %v1941_v25 = vadd.f32 1.0, %v1920_v29  ;;  %p1472_p10 = pnand %p1471_p9, %p1465_p3 }
  0x84   : > { %3330 = vst [vmem:[#allocation44_spill] sm:$0xff] %v1843_v49  ;;  %3331 = vst [vmem:[#allocation45_spill] sm:$0xff] %v1848_v53  ;;  %v284_v49 = vld [vmem:[%s1710_s28 + $0xd0] sm:$0xff]  ;;  %v1923_v58 = vadd.f32 1.0, %v1909_v50  ;;  %v1927_v0 = vmul.f32 %v286_v42, %v286_v42  ;;  %v1929_v20 = vmul.f32 %v287_v38, %v287_v38  ;;  %v1935_v28 = vld [vmem:[%s1717_s24 + $0x18] sm:$0xff]  ;;  %v1943_v24 = vmul.f32 %v288_v40, %v288_v40 }
  0x85   : > { %3332 = vst [vmem:[#allocation46_spill] sm:$0xff] %v1850_v54  ;;  %3333 = vst [vmem:[#allocation47_spill] sm:$0xff] %v1852_v55  ;;  %v1917_v57 = vmul.f32 %v284_v49, %v284_v49  ;;  %v1932_v27 = vld [vmem:[%s1717_s24 + $0x10] sm:$0xff]  ;;  %v1938_v49 = vld [vmem:[%s1717_s24 + $0x20] sm:$0xff]  ;;  %v1945_v34 = vmul.f32 %v289_v45, %v289_v45  ;;  %v1949_v42 = vadd.s32 %v1825_v41, %v1723_v1  ;;  %v1964_v40 = vadd.f32 1.0, %v1935_v28 }
  0x86   : > { %3334 = vst [vmem:[#allocation48_spill] sm:$0xff] %v1857_v59  ;;  %3335 = vst [vmem:[#allocation49_spill] sm:$0xff] %v1859_v60  ;;  %v1952_v38 = vld [vmem:[%s1717_s24 + $0x28] sm:$0xff]  ;;  %v1955_v23 = vld [vmem:[%s1717_s24 + $0x30] sm:$0xff]  ;;  %v1961_v18 = vadd.f32 1.0, %v1932_v27  ;;  %v1967_v45 = vadd.f32 1.0, %v1938_v49  ;;  %v1971_v1 = vadd.s32 %v1825_v41, %v1727_v2  ;;  %v1993_v2 = vadd.s32 %v1825_v41, %v1730_v3 }
  0x87   : > { %3336 = vst [vmem:[#allocation50_spill] sm:$0xff] %v1861_v61  ;;  %3337 = vst [vmem:[#allocation51_spill] sm:$0xff] %v1863_v62  ;;  %v1958_v19 = vld [vmem:[%s1717_s24 + $0x38] sm:$0xff]  ;;  %v1974_v17 = vld [vmem:[%s1717_s24 + $0x40] sm:$0xff]  ;;  %v1983_v14 = vadd.f32 1.0, %v1952_v38  ;;  %v1986_v13 = vadd.f32 1.0, %v1955_v23 }
  0x88   : > { %3338 = vst [vmem:[#allocation52_spill] sm:$0xff] %v1868_v21  ;;  %3339 = vst [vmem:[#allocation53_spill] sm:$0xff] %v1894_v36  ;;  %v1977_v16 = vld [vmem:[%s1717_s24 + $0x48] sm:$0xff]  ;;  %v1980_v15 = vld [vmem:[%s1717_s24 + $0x50] sm:$0xff]  ;;  %v1989_v12 = vadd.f32 1.0, %v1958_v19  ;;  %v2005_v8 = vadd.f32 1.0, %v1974_v17 }
  0x89   : > { %3340 = vst [vmem:[#allocation54_spill] sm:$0xff] %v1896_v35  ;;  %3341 = vst [vmem:[#allocation55_spill] sm:$0xff] %v1900_v46  ;;  %v1996_v11 = vld [vmem:[%s1717_s24 + $0x58] sm:$0xff]  ;;  %v1999_v10 = vld [vmem:[%s1717_s24 + $0x60] sm:$0xff]  ;;  %v2008_v7 = vadd.f32 1.0, %v1977_v16  ;;  %v2011_v6 = vadd.f32 1.0, %v1980_v15 }
  0x8a   : > { %3342 = vst [vmem:[#allocation56_spill] sm:$0xff] %v1902_v47  ;;  %3343 = vst [vmem:[#allocation57_spill] sm:$0xff] %v1904_v31  ;;  %v2002_v9 = vld [vmem:[%s1717_s24 + $0x68] sm:$0xff]  ;;  %v2019_v5 = vld [vmem:[%s1717_s24 + $0x78] sm:$0xff]  ;;  %v422_v62 = vmul.f32 1.442695, %v1932_v27 }
  0x8b   : > { %3344 = vst [vmem:[#allocation58_spill] sm:$0xff] %v1906_v30  ;;  %3345 = vst [vmem:[#allocation59_spill] sm:$0xff] %v1911_v51  ;;  %v2036_v53 = vld [vmem:[%s1717_s24 + $0x88] sm:$0xff]  ;;  %v2056_v54 = vld [vmem:[%s1717_s24 + $0xa0] sm:$0xff]  ;;  %v424_v21 = vmul.f32 1.442695, %v1935_v28 }
  0x8c   : > { %3346 = vst [vmem:[#allocation60_spill] sm:$0xff] %v1913_v52  ;;  %3347 = vst [vmem:[#allocation61_spill] sm:$0xff] %v1915_v56  ;;  %v2062_v41 = vld [vmem:[%s1717_s24 + $0xb0] sm:$0xff]  ;;  %v2076_v55 = vld [vmem:[%s1717_s24 + $0xb8] sm:$0xff]  ;;  %v428_v28 = vmul.f32 1.442695, %v1952_v38 }
  0x8d   : > { %3348 = vst [vmem:[#allocation62_spill] sm:$0xff] %v1917_v57  ;;  %3349 = vst [vmem:[#allocation63_spill] sm:$0xff] %v1923_v58  ;;  %v2039_v58 = vld [vmem:[%s1717_s24 + $0x90] sm:$0xff]  ;;  %v2082_v4 = vld [vmem:[%s1717_s24 + $0xc8] sm:$0xff] }
  0x8e   : > { %3350 = vst [vmem:[#allocation64_spill] sm:$0xff] %v1925_v63  ;;  %3351 = vst [vmem:[#allocation65_spill] sm:$0xff] %v1927_v0  ;;  %v2096_v59 = vld [vmem:[%s1717_s24 + $0xd0] sm:$0xff]  ;;  %v2117_v3 = vadd.f32 1.0, %v2082_v4  ;;  %v3404_v63 = vld [vmem:[#allocation14_spill] sm:$0xff] }
  0x8f   : > { %3352 = vst [vmem:[#allocation66_spill] sm:$0xff] %v1929_v20  ;;  %3353 = vst [vmem:[#allocation67_spill] sm:$0xff] %v1941_v25  ;;  %v2059_v25 = vld [vmem:[%s1717_s24 + $0xa8] sm:$0xff]  ;;  %v2120_v60 = vadd.f32 1.0, %v2096_v59  ;;  %v3451_v35 = vld [vmem:[#allocation24_spill] sm:$0xff] }
  0x90   : > { %3354 = vst [vmem:[#allocation68_spill] sm:$0xff] %v1943_v24  ;;  %3355 = vst [vmem:[#allocation69_spill] sm:$0xff] %v1945_v34  ;;  %v2114_v34 = vld [vmem:[%s1717_s24 + $0xe8] sm:$0xff] }
  0x91   : > { %3356 = vst [vmem:[#allocation70_spill] sm:$0xff] %v1949_v42  ;;  %3357 = vst [vmem:[#allocation71_spill] sm:$0xff] %v1955_v23  ;;  %v2025_v42 = vadd.f32 1.0, %v1996_v11  ;;  %v418_v23 = vmul.f32 1.442695, %v1909_v50 }
  0x92   : > { %3358 = vst [vmem:[#allocation72_spill] sm:$0xff] %v1958_v19  ;;  %3359 = vst [vmem:[#allocation73_spill] sm:$0xff] %v1961_v18  ;;  %v2079_v18 = vld [vmem:[%s1717_s24 + $0xc0] sm:$0xff]  ;;  %v2102_v19 = vadd.f32 1.0, %v2076_v55 }
  0x93   : > { %3360 = vst [vmem:[#allocation74_spill] sm:$0xff] %v1964_v40  ;;  %3361 = vst [vmem:[#allocation75_spill] sm:$0xff] %v1967_v45  ;;  %v2099_v40 = vld [vmem:[%s1717_s24 + $0xd8] sm:$0xff]  ;;  %1278 = vpow2.f32 %v418_v23 }
  0x94   : > { %3362 = vst [vmem:[#allocation76_spill] sm:$0xff] %v1971_v1  ;;  %3363 = vst [vmem:[#allocation77_spill] sm:$0xff] %v1974_v17  ;;  %v2022_v1 = vld [vmem:[%s1717_s24 + $0x80] sm:$0xff]  ;;  %v2042_v17 = vld [vmem:[%s1717_s24 + $0x98] sm:$0xff]  ;;  %v2132_v50 = vadd.f32 1.0, %v2099_v40 }
  0x95   : > { %3364 = vst [vmem:[#allocation78_spill] sm:$0xff] %v1977_v16  ;;  %3365 = vst [vmem:[#allocation79_spill] sm:$0xff] %v1980_v15  ;;  %v2028_v16 = vadd.f32 1.0, %v1999_v10  ;;  %v2031_v15 = vadd.f32 1.0, %v2002_v9 }
  0x96   : > { %3366 = vst [vmem:[#allocation80_spill] sm:$0xff] %v1983_v14  ;;  %3367 = vst [vmem:[#allocation81_spill] sm:$0xff] %v1986_v13  ;;  %v2138_v14 = vadd.f32 1.0, %v2114_v34  ;;  %v426_v13 = vmul.f32 1.442695, %v1938_v49  ;;  %v3405_v49 = vld [vmem:[#allocation39_spill] sm:$0xff] }
  0x97   : > { %3368 = vst [vmem:[#allocation82_spill] sm:$0xff] %v1989_v12  ;;  %3369 = vst [vmem:[#allocation83_spill] sm:$0xff] %v1993_v2  ;;  %v2016_v2 = vld [vmem:[%s1717_s24 + $0x70] sm:$0xff] }
  0x98   : > { %3370 = vst [vmem:[#allocation84_spill] sm:$0xff] %v1996_v11  ;;  %3371 = vst [vmem:[#allocation85_spill] sm:$0xff] %v1999_v10  ;;  %v2045_v11 = vadd.f32 1.0, %v2016_v2  ;;  %v2048_v10 = vadd.f32 1.0, %v2019_v5 }
  0x99   : > { %3372 = vst [vmem:[#allocation86_spill] sm:$0xff] %v2002_v9  ;;  %3373 = vst [vmem:[#allocation87_spill] sm:$0xff] %v2016_v2  ;;  %v2051_v9 = vadd.f32 1.0, %v2022_v1  ;;  %v2065_v2 = vadd.f32 1.0, %v2036_v53  ;;  %v3403_v27 = vld [vmem:[#allocation72_spill] sm:$0xff] }
  0x9a   : > { %3374 = vst [vmem:[#allocation88_spill] sm:$0xff] %v2019_v5  ;;  %3375 = vst [vmem:[#allocation89_spill] sm:$0xff] %v2022_v1  ;;  %v2068_v5 = vadd.f32 1.0, %v2039_v58  ;;  %v2071_v1 = vadd.f32 1.0, %v2042_v17 }
  0x9b   : > { %3376 = vst [vmem:[#allocation90_spill] sm:$0xff] %v2036_v53  ;;  %3377 = vst [vmem:[#allocation91_spill] sm:$0xff] %v2039_v58  ;;  %v2085_v53 = vadd.f32 1.0, %v2056_v54  ;;  %v2088_v58 = vadd.f32 1.0, %v2059_v25 }
  0x9c   : > { %3378 = vst [vmem:[#allocation92_spill] sm:$0xff] %v2042_v17  ;;  %3379 = vst [vmem:[#allocation93_spill] sm:$0xff] %v2056_v54  ;;  %v2091_v17 = vadd.f32 1.0, %v2062_v41  ;;  %v2105_v54 = vadd.f32 1.0, %v2079_v18 }
  0x9d   : > { %3380 = vst [vmem:[#allocation94_spill] sm:$0xff] %v2059_v25  ;;  %3381 = vst [vmem:[#allocation95_spill] sm:$0xff] %v2062_v41  ;;  %v2111_v41 = vld [vmem:[%s1717_s24 + $0xe0] sm:$0xff]  ;;  %v2129_v25 = vld [vmem:[%s1717_s24 + $0xf8] sm:$0xff] }
  0x9e   : > { %3382 = vst [vmem:[#allocation96_spill] sm:$0xff] %v2068_v5  ;;  %3383 = vst [vmem:[#allocation97_spill] sm:$0xff] %v2071_v1  ;;  %v2135_v61 = vadd.f32 1.0, %v2111_v41 }
  0x9f   : > { %3384 = vst [vmem:[#allocation98_spill] sm:$0xff] %v2076_v55  ;;  %3385 = vst [vmem:[#allocation99_spill] sm:$0xff] %v2079_v18  ;;  %v420_v18 = vmul.f32 1.442695, %v1920_v29  ;;  %v2126_v55 = vld [vmem:[%s1717_s24 + $0xf0] sm:$0xff]  ;;  %v2146_v29 = vadd.f32 1.0, %v2129_v25 }
  0xa0   : > { %3386 = vst [vmem:[#allocation100_spill] sm:$0xff] %v2085_v53  ;;  %3387 = vst [vmem:[#allocation101_spill] sm:$0xff] %v2088_v58  ;;  %v2143_v45 = vadd.f32 1.0, %v2126_v55  ;;  %v3409_v38 = vld [vmem:[#allocation84_spill] sm:$0xff]  ;;  %v3411_v12 = vld [vmem:[#allocation86_spill] sm:$0xff] }
  0xa1   : > { %3388 = vst [vmem:[#allocation102_spill] sm:$0xff] %v2091_v17  ;;  %3389 = vst [vmem:[#allocation103_spill] sm:$0xff] %v2096_v59  ;;  %1280 = vpow2.f32 %v420_v18  ;;  %v3402_v59 = vld [vmem:[#allocation71_spill] sm:$0xff]  ;;  %v440_v24 = vmul.f32 1.442695, %v3409_v38  ;;  %v3428_v17 = vld [vmem:[#allocation46_spill] sm:$0xff] }
  0xa2   : > { %3390 = vst [vmem:[#allocation104_spill] sm:$0xff] %v2102_v19  ;;  %3391 = vst [vmem:[#allocation105_spill] sm:$0xff] %v2105_v54  ;;  %1282 = vpow2.f32 %v422_v62  ;;  %v430_v57 = vmul.f32 1.442695, %v3402_v59  ;;  %v432_v62 = vmul.f32 1.442695, %v3403_v27 }
  0xa3   : > { %3392 = vst [vmem:[#allocation106_spill] sm:$0xff] %v2111_v41  ;;  %3393 = vst [vmem:[#allocation107_spill] sm:$0xff] %v2114_v34  ;;  %1284 = vpow2.f32 %v424_v21  ;;  %v3406_v41 = vld [vmem:[#allocation77_spill] sm:$0xff]  ;;  %v3407_v34 = vld [vmem:[#allocation78_spill] sm:$0xff]  ;;  %v444_v59 = vmul.f32 1.442695, %v3411_v12 }
  0xa4   : > { %3394 = vst [vmem:[#allocation108_spill] sm:$0xff] %v2117_v3  ;;  %3395 = vst [vmem:[#allocation109_spill] sm:$0xff] %v2120_v60  ;;  %v434_v0 = vmul.f32 1.442695, %v3406_v41  ;;  %v436_v20 = vmul.f32 1.442695, %v3407_v34  ;;  %1286 = vpow2.f32 %v426_v13 }
  0xa5   : > { %3396 = vst [vmem:[#allocation110_spill] sm:$0xff] %v2132_v50  ;;  %3397 = vst [vmem:[#allocation111_spill] sm:$0xff] %v2135_v61  ;;  %v2204_v50 = vadd.s32 %v3405_v49, %v3404_v63  ;;  %1288 = vpow2.f32 %v428_v28  ;;  %v3412_v27 = vld [vmem:[#allocation87_spill] sm:$0xff]  ;;  %v3413_v63 = vld [vmem:[#allocation88_spill] sm:$0xff] }
  0xa6   : > { %3398 = vst [vmem:[#allocation112_spill] sm:$0xff] %v2138_v14  ;;  %3399 = vst [vmem:[#allocation113_spill] sm:$0xff] %v2143_v45  ;;  %v3408_v14 = vld [vmem:[#allocation79_spill] sm:$0xff]  ;;  %v3410_v45 = vld [vmem:[#allocation85_spill] sm:$0xff]  ;;  %v446_v61 = vmul.f32 1.442695, %v3412_v27  ;;  %1290 = vpow2.f32 %v430_v57 }
  0xa7   : > { %3400 = vst [vmem:[#allocation114_spill] sm:$0xff] %v2146_v29  ;;  %v438_v23 = vmul.f32 1.442695, %v3408_v14  ;;  %v442_v18 = vmul.f32 1.442695, %v3410_v45  ;;  %v1279_v29 = vpop.eup %1278  ;;  %v3414_v21 = vld [vmem:[#allocation89_spill] sm:$0xff]  ;;  %1292 = vpow2.f32 %v432_v62 }
  0xa8   : > { %v448_v60 = vmul.f32 1.442695, %v3413_v63  ;;  %v450_v56 = vmul.f32 1.442695, %v3414_v21  ;;  %v3415_v34 = vld [vmem:[#allocation90_spill] sm:$0xff]  ;;  %v3416_v14 = vld [vmem:[#allocation91_spill] sm:$0xff]  ;;  %1294 = vpow2.f32 %v434_v0 }
  0xa9   : > { %v452_v3 = vmul.f32 1.442695, %v3415_v34  ;;  %v454_v13 = vmul.f32 1.442695, %v3416_v14  ;;  %v3417_v52 = vld [vmem:[#allocation92_spill] sm:$0xff]  ;;  %v3418_v45 = vld [vmem:[#allocation93_spill] sm:$0xff]  ;;  %1296 = vpow2.f32 %v436_v20 }
  0xaa   : > { %v456_v38 = vmul.f32 1.442695, %v3417_v52  ;;  %v458_v54 = vmul.f32 1.442695, %v3418_v45  ;;  %v3419_v12 = vld [vmem:[#allocation94_spill] sm:$0xff]  ;;  %v3420_v28 = vld [vmem:[#allocation95_spill] sm:$0xff]  ;;  %1298 = vpow2.f32 %v438_v23 }
  0xab   : > { %v1281_v41 = vpop.eup %1280  ;;  %v2220_v51 = vmul.f32 1.442695, %v3419_v12  ;;  %v2223_v27 = vmul.f32 1.442695, %v3420_v28  ;;  %v3421_v63 = vld [vmem:[#allocation98_spill] sm:$0xff]  ;;  %v3422_v57 = vld [vmem:[#allocation99_spill] sm:$0xff]  ;;  %1300 = vpow2.f32 %v440_v24 }
  0xac   : > { %v2226_v21 = vmul.f32 1.442695, %v3421_v63  ;;  %v2229_v19 = vmul.f32 1.442695, %v3422_v57  ;;  %v2232_v34 = vmul.f32 1.442695, %v2082_v4  ;;  %v1283_v63 = vpop.eup %1282  ;;  %1302 = vpow2.f32 %v442_v18 }
  0xad   : > { %v3423_v52 = vld [vmem:[#allocation103_spill] sm:$0xff]  ;;  %v3425_v45 = vld [vmem:[#allocation45_spill] sm:$0xff]  ;;  %v2244_v57 = vmul.f32 1.442695, %v2099_v40  ;;  %v3430_v58 = vld [vmem:[#allocation70_spill] sm:$0xff]  ;;  %1304 = vpow2.f32 %v444_v59  ;;  %vm551_vm3 = vcmp.lt.s32.totalorder %v2204_v50, 1000 }
  0xae   : > { %v2235_v62 = vmul.f32 1.442695, %v3423_v52  ;;  %v3424_v14 = vld [vmem:[#allocation63_spill] sm:$0xff]  ;;  %vm548_vm0 = vcmp.lt.s32.totalorder %v3430_v58, 1000  ;;  %v3431_v4 = vld [vmem:[#allocation76_spill] sm:$0xff]  ;;  %v3432_v20 = vld [vmem:[#allocation106_spill] sm:$0xff]  ;;  %1306 = vpow2.f32 %v446_v61 }
  0xaf   : > { %v3426_v12 = vsub.f32 %v3424_v14, %v3425_v45  ;;  %v3427_v28 = vld [vmem:[#allocation67_spill] sm:$0xff]  ;;  %vm549_vm1 = vcmp.lt.s32.totalorder %v3431_v4, 1000  ;;  %v2249_v52 = vmul.f32 1.442695, %v3432_v20  ;;  %v3436_v58 = vld [vmem:[#allocation16_spill] sm:$0xff]  ;;  %v3437_v45 = vld [vmem:[#allocation73_spill] sm:$0xff]  ;;  %1308 = vpow2.f32 %v448_v60 }
  0xb0   : > { %v3429_v0 = vsub.f32 %v3427_v28, %v3428_v17  ;;  %v3433_v47 = vld [vmem:[#allocation107_spill] sm:$0xff]  ;;  %v2258_v17 = vmul.f32 1.442695, %v2129_v25  ;;  %v2266_v24 = vadd.s32 %v3405_v49, %v3436_v58  ;;  %v3440_v25 = vld [vmem:[#allocation17_spill] sm:$0xff]  ;;  %v3441_v20 = vld [vmem:[#allocation18_spill] sm:$0xff]  ;;  %1310 = vpow2.f32 %v450_v56 }
  0xb1   : > { %v482_v30 = vsub.f32 %v3426_v12, %v1279_v29  ;;  %v2252_v14 = vmul.f32 1.442695, %v3433_v47  ;;  %v2255_v29 = vmul.f32 1.442695, %v2126_v55  ;;  %v3435_v40 = vld [vmem:[#allocation15_spill] sm:$0xff]  ;;  %v2273_v4 = vadd.s32 %v3405_v49, %v3440_v25  ;;  %v3445_v61 = vld [vmem:[#allocation21_spill] sm:$0xff] }
  0xb2   : > { %v483_v31 = vsub.f32 %v3429_v0, %v1281_v41  ;;  %3434 = vst [vmem:[#allocation71_spill] sm:$0xff] %v2258_v17  ;;  %v2262_v23 = vadd.s32 %v3405_v49, %v3435_v40  ;;  %v1285_v41 = vpop.eup %1284  ;;  %v3438_v47 = vld [vmem:[#allocation47_spill] sm:$0xff]  ;;  %v2277_v40 = vadd.s32 %v3405_v49, %v3441_v20  ;;  %1312 = vpow2.f32 %v452_v3  ;;  %v3448_v17 = vld [vmem:[#allocation74_spill] sm:$0xff] }
  0xb3   : > { %v3439_v12 = vsub.f32 %v3437_v45, %v3438_v47  ;;  %v580_v55 = vsel %vm548_vm0, %v482_v30, 0.0  ;;  %v1287_v18 = vpop.eup %1286  ;;  %v3442_v58 = vld [vmem:[#allocation83_spill] sm:$0xff]  ;;  %v3444_v30 = vld [vmem:[#allocation20_spill] sm:$0xff]  ;;  %1314 = vpow2.f32 %v454_v13  ;;  %v3465_v50 = vld [vmem:[#allocation30_spill] sm:$0xff]  ;;  %vm553_vm5 = vcmp.lt.s32.totalorder %v2266_v24, 1000 }
  0xb4   : > { %v581_v0 = vsel %vm549_vm1, %v483_v31, 0.0  ;;  %vm550_vm2 = vcmp.lt.s32.totalorder %v3442_v58, 1000  ;;  %v1289_v53 = vpop.eup %1288  ;;  %v3443_v59 = vld [vmem:[#allocation19_spill] sm:$0xff]  ;;  %v2286_v31 = vadd.s32 %v3405_v49, %v3444_v30  ;;  %v3449_v30 = vld [vmem:[#allocation48_spill] sm:$0xff]  ;;  %1316 = vpow2.f32 %v456_v38  ;;  %v3493_v24 = vld [vmem:[#allocation42_spill] sm:$0xff] }
  0xb5   : > { %v484_v28 = vsub.f32 %v3439_v12, %v1283_v63  ;;  %v2282_v45 = vadd.s32 %v3405_v49, %v3443_v59  ;;  %v2290_v63 = vadd.s32 %v3405_v49, %v3445_v61  ;;  %v1291_v47 = vpop.eup %1290  ;;  %v3446_v12 = vld [vmem:[#allocation22_spill] sm:$0xff]  ;;  %v3447_v58 = vld [vmem:[#allocation23_spill] sm:$0xff]  ;;  %v612_v59 = vadd.f32 %v581_v0, %v580_v55  ;;  %v3461_v13 = vld [vmem:[#allocation28_spill] sm:$0xff] }
  0xb6   : > { %v2294_v20 = vadd.s32 %v3405_v49, %v3446_v12  ;;  %v2298_v60 = vadd.s32 %v3405_v49, %v3447_v58  ;;  %v1293_v25 = vpop.eup %1292  ;;  %v3450_v46 = vsub.f32 %v3448_v17, %v3449_v30  ;;  %v2305_v61 = vadd.s32 %v3405_v49, %v3451_v35  ;;  %v3452_v12 = vld [vmem:[#allocation25_spill] sm:$0xff]  ;;  %v3454_v58 = vld [vmem:[#allocation26_spill] sm:$0xff]  ;;  %v3459_v30 = vld [vmem:[#allocation27_spill] sm:$0xff] }
  0xb7   : > { %v582_v56 = vsel %vm550_vm2, %v484_v28, 0.0  ;;  %v1295_v5 = vpop.eup %1294  ;;  %v2309_v36 = vadd.s32 %v3405_v49, %v3452_v12  ;;  %v2313_v55 = vadd.s32 %v3405_v49, %v3454_v58  ;;  %v3457_v17 = vld [vmem:[#allocation49_spill] sm:$0xff]  ;;  %v2321_v28 = vadd.s32 %v3405_v49, %v3459_v30 }
  0xb8   : > { %v485_v1 = vsub.f32 %v3450_v46, %v1285_v41  ;;  %v1297_v3 = vpop.eup %1296  ;;  %v3456_v46 = vld [vmem:[#allocation75_spill] sm:$0xff]  ;;  %v2325_v12 = vadd.s32 %v3405_v49, %v3461_v13  ;;  %1318 = vpow2.f32 %v458_v54  ;;  %v3463_v58 = vld [vmem:[#allocation29_spill] sm:$0xff]  ;;  %v2333_v38 = vadd.s32 %v3405_v49, %v3465_v50 }
  0xb9   : > { %3453 = vst [vmem:[#allocation72_spill] sm:$0xff] %v2309_v36  ;;  %3455 = vst [vmem:[#allocation39_spill] sm:$0xff] %v2313_v55  ;;  %v3458_v41 = vsub.f32 %v3456_v46, %v3457_v17  ;;  %v1299_v35 = vpop.eup %1298  ;;  %v2329_v55 = vadd.s32 %v3405_v49, %v3463_v58  ;;  %v613_v46 = vadd.f32 %v612_v59, %v582_v56  ;;  %1320 = vpow2.f32 %v2220_v51  ;;  %v3467_v17 = vld [vmem:[#allocation80_spill] sm:$0xff]  ;;  %v3470_v13 = vld [vmem:[#allocation31_spill] sm:$0xff] }
  0xba   : > { %3460 = vst [vmem:[#allocation77_spill] sm:$0xff] %v2321_v28  ;;  %3462 = vst [vmem:[#allocation78_spill] sm:$0xff] %v2325_v12  ;;  %v2341_v12 = vadd.s32 %v3405_v49, %v3470_v13  ;;  %v583_v54 = vsel %vm551_vm3, %v485_v1, 0.0  ;;  %1322 = vpow2.f32 %v2223_v27  ;;  %v3471_v58 = vld [vmem:[#allocation81_spill] sm:$0xff]  ;;  %v3474_v59 = vld [vmem:[#allocation32_spill] sm:$0xff]  ;;  %vm552_vm4 = vcmp.lt.s32.totalorder %v2262_v23, 1000 }
  0xbb   : > { %v486_v0 = vsub.f32 %v3458_v41, %v1287_v18  ;;  %3464 = vst [vmem:[#allocation79_spill] sm:$0xff] %v2329_v55  ;;  %3466 = vst [vmem:[#allocation84_spill] sm:$0xff] %v2333_v38  ;;  %v1301_v18 = vpop.eup %1300  ;;  %v3468_v41 = vld [vmem:[#allocation50_spill] sm:$0xff]  ;;  %v3472_v55 = vld [vmem:[#allocation51_spill] sm:$0xff]  ;;  %v2349_v56 = vadd.s32 %v3405_v49, %v3474_v59  ;;  %1324 = vpow2.f32 %v2226_v21  ;;  %vm554_vm6 = vcmp.lt.s32.totalorder %v2273_v4, 1000 }
  0xbc   : > { %v3469_v30 = vsub.f32 %v3467_v17, %v3468_v41  ;;  %v1303_v36 = vpop.eup %1302  ;;  %v3473_v50 = vsub.f32 %v3471_v58, %v3472_v55  ;;  %v3478_v41 = vld [vmem:[#allocation33_spill] sm:$0xff]  ;;  %v3479_v58 = vld [vmem:[#allocation34_spill] sm:$0xff]  ;;  %1326 = vpow2.f32 %v2229_v19  ;;  %v3480_v23 = vld [vmem:[#allocation35_spill] sm:$0xff]  ;;  %vm555_vm7 = vcmp.lt.s32.totalorder %v2277_v40, 1000 }
  0xbd   : > { %v1305_v51 = vpop.eup %1304  ;;  %v2360_v27 = vadd.s32 %v3405_v49, %v3478_v41  ;;  %v3481_v21 = vld [vmem:[#allocation36_spill] sm:$0xff]  ;;  %1328 = vpow2.f32 %v2232_v34  ;;  %v3483_v41 = vld [vmem:[#allocation37_spill] sm:$0xff]  ;;  %v584_v59 = vsel %vm552_vm4, %v486_v0, 0.0  ;;  %vm556_vm8 = vcmp.lt.s32.totalorder %v2282_v45, 1000  ;;  %v3542_v13 = vld [vmem:[#allocation111_spill] sm:$0xff] }
  0xbe   : > { %v487_v28 = vsub.f32 %v3469_v30, %v1289_v53  ;;  %v488_v38 = vsub.f32 %v3473_v50, %v1291_v47  ;;  %v3475_v53 = vld [vmem:[#allocation82_spill] sm:$0xff]  ;;  %v3476_v30 = vld [vmem:[#allocation52_spill] sm:$0xff]  ;;  %v2364_v47 = vadd.s32 %v3405_v49, %v3479_v58  ;;  %v1307_v55 = vpop.eup %1306  ;;  %v2369_v50 = vadd.s32 %v3405_v49, %v3480_v23 }
  0xbf   : > { %v3477_v17 = vsub.f32 %v3475_v53, %v3476_v30  ;;  %v2373_v53 = vadd.s32 %v3405_v49, %v3481_v21  ;;  %v1309_v30 = vpop.eup %1308  ;;  %v2383_v19 = vadd.s32 %v3405_v49, %v3483_v41  ;;  %1330 = vpow2.f32 %v2235_v62  ;;  %v3489_v62 = vld [vmem:[#allocation40_spill] sm:$0xff] }
  0xc0   : > { %v1311_v23 = vpop.eup %1310  ;;  %v3485_v21 = vsub.f32 %v2008_v7, %v1872_v48  ;;  %1332 = vpow2.f32 %v2244_v57  ;;  %v2404_v0 = vadd.s32 %v3405_v49, %v3489_v62  ;;  %v3491_v7 = vld [vmem:[#allocation41_spill] sm:$0xff]  ;;  %v3495_v57 = vld [vmem:[#allocation44_spill] sm:$0xff]  ;;  %vm557_vm9 = vcmp.lt.s32.totalorder %v2286_v31, 1000  ;;  %v3537_v62 = vld [vmem:[#allocation62_spill] sm:$0xff] }
  0xc1   : > { %v2356_v1 = vsub.f32 %v3477_v17, %v1293_v25  ;;  %v614_v25 = vadd.f32 %v613_v46, %v583_v54  ;;  %v3482_v17 = vsub.f32 %v2005_v8, %v1870_v22  ;;  %3484 = vst [vmem:[#allocation85_spill] sm:$0xff] %v2383_v19  ;;  %v3486_v54 = vld [vmem:[#allocation38_spill] sm:$0xff]  ;;  %v3488_v8 = vsub.f32 %v2011_v6, %v1874_v26 }
  0xc2   : > { %v2389_v46 = vsub.f32 %v3485_v21, %v1297_v3  ;;  %v2393_v34 = vadd.s32 %v3405_v49, %v3486_v54  ;;  %3490 = vst [vmem:[#allocation87_spill] sm:$0xff] %v2404_v0  ;;  %v2408_v48 = vadd.s32 %v3405_v49, %v3491_v7  ;;  %1334 = vpow2.f32 %v2249_v52 }
  0xc3   : > { %v2379_v58 = vsub.f32 %v3482_v17, %v1295_v5  ;;  %v1313_v5 = vpop.eup %1312  ;;  %v2400_v22 = vsub.f32 %v3488_v8, %v1299_v35  ;;  %v2413_v21 = vadd.s32 %v3405_v49, %v3493_v24  ;;  %v2417_v6 = vadd.s32 %v3405_v49, %v3495_v57  ;;  %v3536_v57 = vld [vmem:[#allocation109_spill] sm:$0xff] }
  0xc4   : > { %3487 = vst [vmem:[#allocation86_spill] sm:$0xff] %v2393_v34  ;;  %3492 = vst [vmem:[#allocation88_spill] sm:$0xff] %v2408_v48  ;;  %v1315_v3 = vpop.eup %1314  ;;  %v615_v35 = vadd.f32 %v614_v25, %v584_v59  ;;  %1336 = vpow2.f32 %v2252_v14  ;;  %v3497_v17 = vsub.f32 %v2025_v42, %v1879_v32  ;;  %v3498_v52 = vsub.f32 %v2028_v16, %v1881_v44 }
  0xc5   : > { %3494 = vst [vmem:[#allocation89_spill] sm:$0xff] %v2413_v21  ;;  %3496 = vst [vmem:[#allocation90_spill] sm:$0xff] %v2417_v6  ;;  %v1317_v26 = vpop.eup %1316  ;;  %v585_v24 = vsel %vm553_vm5, %v487_v28, 0.0  ;;  %1338 = vpow2.f32 %v2255_v29  ;;  %v3499_v49 = vsub.f32 %v2031_v15, %v1883_v43  ;;  %v3500_v14 = vsub.f32 %v2045_v11, %v1885_v33  ;;  %v3505_v28 = vld [vmem:[#allocation96_spill] sm:$0xff] }
  0xc6   : > { %v2423_v8 = vsub.f32 %v3497_v17, %v1301_v18  ;;  %v2428_v7 = vsub.f32 %v3498_v52, %v1303_v36  ;;  %v1319_v21 = vpop.eup %1318  ;;  %v3501_v16 = vsub.f32 %v2048_v10, %v1890_v37  ;;  %v3502_v15 = vsub.f32 %v2051_v9, %v1892_v39  ;;  %v3503_v10 = vld [vmem:[#allocation53_spill] sm:$0xff]  ;;  %v3506_v18 = vld [vmem:[#allocation54_spill] sm:$0xff]  ;;  %v3514_v17 = vld [vmem:[#allocation100_spill] sm:$0xff] }
  0xc7   : > { %v495_v59 = vsub.f32 %v3499_v49, %v1305_v51  ;;  %v496_v25 = vsub.f32 %v3500_v14, %v1307_v55  ;;  %v1321_v32 = vpop.eup %1320  ;;  %vm558_vm10 = vcmp.lt.s32.totalorder %v2290_v63, 1000  ;;  %vm559_vm11 = vcmp.lt.s32.totalorder %v2294_v20, 1000  ;;  %v3508_v51 = vld [vmem:[#allocation97_spill] sm:$0xff]  ;;  %v3509_v55 = vld [vmem:[#allocation55_spill] sm:$0xff]  ;;  %v3515_v52 = vld [vmem:[#allocation56_spill] sm:$0xff] }
  0xc8   : > { %v497_v36 = vsub.f32 %v3501_v16, %v1309_v30  ;;  %v1323_v44 = vpop.eup %1322  ;;  %v498_v43 = vsub.f32 %v3502_v15, %v1311_v23  ;;  %v616_v11 = vadd.f32 %v615_v35, %v585_v24  ;;  %v3504_v37 = vsub.f32 %v2065_v2, %v3503_v10  ;;  %v3511_v24 = vld [vmem:[#allocation72_spill] sm:$0xff]  ;;  %v3512_v35 = vld [vmem:[#allocation39_spill] sm:$0xff]  ;;  %v3517_v14 = vld [vmem:[#allocation77_spill] sm:$0xff] }
  0xc9   : > { %v1325_v33 = vpop.eup %1324  ;;  %vm560_vm12 = vcmp.lt.s32.totalorder %v2298_v60, 1000  ;;  %vm561_vm13 = vcmp.lt.s32.totalorder %v2305_v61, 1000  ;;  %v586_v29 = vsel %vm554_vm6, %v488_v38, 0.0  ;;  %v3507_v9 = vsub.f32 %v3505_v28, %v3506_v18  ;;  %v3518_v16 = vld [vmem:[#allocation78_spill] sm:$0xff]  ;;  %v3519_v15 = vld [vmem:[#allocation101_spill] sm:$0xff]  ;;  %v3522_v28 = vld [vmem:[#allocation79_spill] sm:$0xff] }
  0xca   : > { %v499_v42 = vsub.f32 %v3504_v37, %v1313_v5  ;;  %v1327_v4 = vpop.eup %1326  ;;  %v3510_v23 = vsub.f32 %v3508_v51, %v3509_v55  ;;  %vm562_vm14 = vcmp.lt.s32.totalorder %v3511_v24, 1000  ;;  %vm563_vm15 = vcmp.lt.s32.totalorder %v3512_v35, 1000  ;;  %v3513_v5 = vld [vmem:[#allocation71_spill] sm:$0xff]  ;;  %v3520_v10 = vld [vmem:[#allocation57_spill] sm:$0xff]  ;;  %v3523_v18 = vld [vmem:[#allocation84_spill] sm:$0xff] }
  0xcb   : > { %v500_v39 = vsub.f32 %v3507_v9, %v1315_v3  ;;  %v1329_v2 = vpop.eup %1328  ;;  %1340 = vpow2.f32 %v3513_v5  ;;  %v3516_v49 = vsub.f32 %v3514_v17, %v3515_v52  ;;  %vm564_vm0 = vcmp.lt.s32.totalorder %v3517_v14, 1000  ;;  %v3525_v5 = vld [vmem:[#allocation58_spill] sm:$0xff]  ;;  %v3528_v52 = vld [vmem:[#allocation59_spill] sm:$0xff]  ;;  %v2592_v35 = vld [vmem:[%s1717_s24 + $0x120] sm:$0xff] }
  0xcc   : > { %v501_v30 = vsub.f32 %v3510_v23, %v1317_v26  ;;  %v1331_v3 = vpop.eup %1330  ;;  %v3521_v37 = vsub.f32 %v3519_v15, %v3520_v10  ;;  %v617_v9 = vadd.f32 %v616_v11, %v586_v29  ;;  %vm568_vm4 = vcmp.lt.s32.totalorder %v2341_v12, 1000  ;;  %v3524_v23 = vld [vmem:[#allocation102_spill] sm:$0xff]  ;;  %v3527_v29 = vld [vmem:[#allocation104_spill] sm:$0xff]  ;;  %v2586_v24 = vld [vmem:[%s1717_s24 + $0x110] sm:$0xff] }
  0xcd   : > { %v502_v38 = vsub.f32 %v3516_v49, %v1319_v21  ;;  %v1333_v51 = vpop.eup %1332  ;;  %v587_v21 = vsel %vm555_vm7, %v2356_v1, 0.0  ;;  %vm571_vm2 = vcmp.lt.s32.totalorder %v2364_v47, 1000  ;;  %vm572_vm3 = vcmp.lt.s32.totalorder %v2369_v50, 1000  ;;  %v3530_v1 = vld [vmem:[#allocation105_spill] sm:$0xff]  ;;  %v2614_v47 = vld [vmem:[%s1717_s24 + $0x130] sm:$0xff] }
  0xce   : > { %v503_v26 = vsub.f32 %v3521_v37, %v1321_v32  ;;  %v1335_v55 = vpop.eup %1334  ;;  %v3526_v32 = vsub.f32 %v3524_v23, %v3525_v5  ;;  %vm573_vm1 = vcmp.lt.s32.totalorder %v2373_v53, 1000  ;;  %v3529_v49 = vsub.f32 %v3527_v29, %v3528_v52  ;;  %v3533_v23 = vld [vmem:[#allocation108_spill] sm:$0xff]  ;;  %v3534_v5 = vld [vmem:[#allocation61_spill] sm:$0xff]  ;;  %v3539_v52 = vld [vmem:[#allocation110_spill] sm:$0xff] }
  0xcf   : > { %v1337_v11 = vpop.eup %1336  ;;  %vm574_vm6 = vcmp.lt.s32.totalorder %v2383_v19, 1000  ;;  %vm575_vm7 = vcmp.lt.s32.totalorder %v2393_v34, 1000  ;;  %vm576_vm5 = vcmp.lt.s32.totalorder %v2404_v0, 1000  ;;  %v3538_v54 = vsub.f32 %v3536_v57, %v3537_v62  ;;  %v3543_v0 = vld [vmem:[#allocation65_spill] sm:$0xff]  ;;  %v3546_v57 = vld [vmem:[#allocation66_spill] sm:$0xff] }
  0xd0   : > { %v504_v17 = vsub.f32 %v3526_v32, %v1323_v44  ;;  %v505_v15 = vsub.f32 %v3529_v49, %v1325_v33  ;;  %v1339_v40 = vpop.eup %1338  ;;  %v3531_v44 = vld [vmem:[#allocation60_spill] sm:$0xff]  ;;  %v3535_v32 = vsub.f32 %v3533_v23, %v3534_v5  ;;  %v618_v33 = vadd.f32 %v617_v9, %v587_v21  ;;  %v2620_v50 = vld [vmem:[%s1717_s24 + $0x140] sm:$0xff]  ;;  %v2631_v9 = vld [vmem:[%s1717_s24 + $0x148] sm:$0xff] }
  0xd1   : > { %v3532_v10 = vsub.f32 %v3530_v1, %v3531_v44  ;;  %v508_v29 = vsub.f32 %v3538_v54, %v1331_v3  ;;  %v3540_v49 = vld [vmem:[#allocation64_spill] sm:$0xff]  ;;  %v3544_v34 = vsub.f32 %v3542_v13, %v3543_v0  ;;  %v589_v62 = vsel %vm557_vm9, %v2389_v46, 0.0  ;;  %v2658_v1 = vld [vmem:[%s1717_s24 + $0x180] sm:$0xff]  ;;  %v2670_v23 = vld [vmem:[%s1717_s24 + $0x188] sm:$0xff] }
  0xd2   : > { %v507_v6 = vsub.f32 %v3535_v32, %v1329_v2  ;;  %v3541_v41 = vsub.f32 %v3539_v52, %v3540_v49  ;;  %v3545_v54 = vld [vmem:[#allocation112_spill] sm:$0xff]  ;;  %v2520_v13 = vsel %vm558_vm10, %v2400_v22, 0.0  ;;  %v2525_v45 = vsel %vm559_vm11, %v2423_v8, 0.0  ;;  %v2562_v8 = vld [vmem:[%s1717_s24 + $0x100] sm:$0xff]  ;;  %3580 = vst [vmem:[#allocation75_spill] sm:$0xff] %v2658_v1  ;;  %3581 = vst [vmem:[#allocation49_spill] sm:$0xff] %v2670_v23 }
  0xd3   : > { %v506_v37 = vsub.f32 %v3532_v10, %v1327_v4  ;;  %v510_v19 = vsub.f32 %v3544_v34, %v1335_v55  ;;  %v588_v4 = vsel %vm556_vm8, %v2379_v58, 0.0  ;;  %v3547_v2 = vsub.f32 %v3545_v54, %v3546_v57  ;;  %v3550_v58 = vld [vmem:[#allocation68_spill] sm:$0xff]  ;;  %v2640_v55 = vld [vmem:[%s1717_s24 + $0x160] sm:$0xff]  ;;  %v2673_v5 = vld [vmem:[%s1717_s24 + $0x190] sm:$0xff] }
  0xd4   : > { %v509_v48 = vsub.f32 %v3541_v41, %v1333_v51  ;;  %v2530_v31 = vsel %vm560_vm12, %v2428_v7, 0.0  ;;  %v3549_v41 = vld [vmem:[#allocation113_spill] sm:$0xff]  ;;  %v2539_v63 = vsel %vm561_vm13, %v495_v59, 0.0  ;;  %v2543_v20 = vsel %vm562_vm14, %v496_v25, 0.0  ;;  %v2565_v59 = vld [vmem:[%s1717_s24 + $0x108] sm:$0xff]  ;;  %v2634_v51 = vld [vmem:[%s1717_s24 + $0x150] sm:$0xff] }
  0xd5   : > { %v2515_v3 = vsub.f32 %v3547_v2, %v1337_v11  ;;  %v3551_v46 = vsub.f32 %v3549_v41, %v3550_v58  ;;  %v2547_v60 = vsel %vm563_vm15, %v497_v36, 0.0  ;;  %v2551_v22 = vsel %vm564_vm0, %v498_v43, 0.0  ;;  %v2567_v25 = vpop.eup %1340  ;;  %v2637_v21 = vld [vmem:[%s1717_s24 + $0x158] sm:$0xff]  ;;  %3576 = vst [vmem:[#allocation47_spill] sm:$0xff] %v2640_v55  ;;  %3582 = vst [vmem:[#allocation80_spill] sm:$0xff] %v2673_v5  ;;  %v1163_v58 = vld [vmem:[%s1710_s28 + $0x100] sm:$0xff] }
  0xd6   : > { %3553 = vst [vmem:[#allocation93_spill] sm:$0xff] %v2551_v22  ;;  %vm3554_vm8 = vcmp.lt.s32.totalorder %v3518_v16, 1000  ;;  %vm3556_vm9 = vcmp.lt.s32.totalorder %v3522_v28, 1000  ;;  %v619_v7 = vadd.f32 %v618_v33, %v588_v4  ;;  %3558 = vst [vmem:[#allocation98_spill] sm:$0xff] %v2567_v25  ;;  %vm3559_vm10 = vcmp.lt.s32.totalorder %v3523_v18, 1000  ;;  %v2611_v16 = vld [vmem:[%s1717_s24 + $0x128] sm:$0xff] }
  0xd7   : > { %3548 = vst [vmem:[#allocation91_spill] sm:$0xff] %v2515_v3  ;;  %v2535_v34 = vsub.f32 %v3551_v46, %v1339_v40  ;;  %v2555_v0 = vsel %vm3554_vm8, %v499_v42, 0.0  ;;  %v2559_v61 = vsel %vm3556_vm9, %v500_v39, 0.0  ;;  %v2571_v36 = vsel %vm3559_vm10, %v501_v30, 0.0  ;;  %v2589_v30 = vld [vmem:[%s1717_s24 + $0x118] sm:$0xff]  ;;  %3575 = vst [vmem:[#allocation73_spill] sm:$0xff] %v2637_v21 }
  0xd8   : > { %3555 = vst [vmem:[#allocation94_spill] sm:$0xff] %v2555_v0  ;;  %3557 = vst [vmem:[#allocation95_spill] sm:$0xff] %v2559_v61  ;;  %v2575_v43 = vsel %vm568_vm4, %v502_v38, 0.0  ;;  %vm3562_vm11 = vcmp.lt.s32.totalorder %v2349_v56, 1000  ;;  %vm3564_vm12 = vcmp.lt.s32.totalorder %v2360_v27, 1000  ;;  %v2596_v12 = vsel %vm571_vm2, %v505_v15, 0.0 }
  0xd9   : > { %3552 = vst [vmem:[#allocation92_spill] sm:$0xff] %v2535_v34  ;;  %3560 = vst [vmem:[#allocation99_spill] sm:$0xff] %v2571_v36  ;;  %v2579_v42 = vsel %vm3562_vm11, %v503_v26, 0.0  ;;  %v2583_v39 = vsel %vm3564_vm12, %v504_v17, 0.0  ;;  %v2600_v56 = vsel %vm572_vm3, %v506_v37, 0.0  ;;  %v2604_v27 = vsel %vm573_vm1, %v507_v6, 0.0 }
  0xda   : > { %3561 = vst [vmem:[#allocation103_spill] sm:$0xff] %v2575_v43  ;;  %3563 = vst [vmem:[#allocation63_spill] sm:$0xff] %v2579_v42  ;;  %v2608_v14 = vsel %vm574_vm6, %v508_v29, 0.0  ;;  %v2617_v26 = vld [vmem:[%s1717_s24 + $0x138] sm:$0xff]  ;;  %v2624_v53 = vsel %vm575_vm7, %v509_v48, 0.0  ;;  %v2628_v18 = vsel %vm576_vm5, %v510_v19, 0.0  ;;  %v620_v11 = vadd.f32 %v619_v7, %v589_v62 }
  0xdb   : > { %3565 = vst [vmem:[#allocation45_spill] sm:$0xff] %v2583_v39  ;;  %3566 = vst [vmem:[#allocation67_spill] sm:$0xff] %v2596_v12  ;;  %v2643_v17 = vadd.f32 1.0, %v2562_v8  ;;  %v2646_v48 = vadd.f32 1.0, %v2565_v59  ;;  %v2649_v19 = vld [vmem:[%s1717_s24 + $0x168] sm:$0xff]  ;;  %v2652_v15 = vld [vmem:[%s1717_s24 + $0x170] sm:$0xff] }
  0xdc   : > { %3567 = vst [vmem:[#allocation46_spill] sm:$0xff] %v2600_v56  ;;  %3568 = vst [vmem:[#allocation70_spill] sm:$0xff] %v2604_v27  ;;  %v2655_v40 = vld [vmem:[%s1717_s24 + $0x178] sm:$0xff]  ;;  %v2661_v44 = vadd.f32 1.0, %v2586_v24  ;;  %v2664_v10 = vadd.f32 1.0, %v2589_v30  ;;  %v2667_v37 = vadd.f32 1.0, %v2592_v35  ;;  %v621_v3 = vadd.f32 %v620_v11, %v2520_v13 }
  0xdd   : > { %3570 = vst [vmem:[#allocation76_spill] sm:$0xff] %v2608_v14  ;;  %3572 = vst [vmem:[#allocation106_spill] sm:$0xff] %v2624_v53  ;;  %v2676_v32 = vld [vmem:[%s1717_s24 + $0x198] sm:$0xff]  ;;  %v2679_v29 = vadd.f32 1.0, %v2611_v16  ;;  %v2682_v33 = vadd.f32 1.0, %v2614_v47  ;;  %v2685_v52 = vadd.f32 1.0, %v2617_v26 }
  0xde   : > { %3574 = vst [vmem:[#allocation107_spill] sm:$0xff] %v2628_v18  ;;  %3577 = vst [vmem:[#allocation83_spill] sm:$0xff] %v2649_v19  ;;  %v2688_v49 = vadd.f32 1.0, %v2620_v50  ;;  %v2691_v4 = vld [vmem:[%s1717_s24 + $0x1a0] sm:$0xff]  ;;  %v2694_v62 = vld [vmem:[%s1717_s24 + $0x1a8] sm:$0xff]  ;;  %v2697_v54 = vadd.f32 1.0, %v2631_v9 }
  0xdf   : > { %3578 = vst [vmem:[#allocation74_spill] sm:$0xff] %v2652_v15  ;;  %3579 = vst [vmem:[#allocation48_spill] sm:$0xff] %v2655_v40  ;;  %v2700_v57 = vadd.f32 1.0, %v2634_v51  ;;  %v2703_v2 = vadd.f32 1.0, %v2637_v21  ;;  %v2706_v41 = vadd.f32 1.0, %v2640_v55  ;;  %v1164_v46 = vld [vmem:[%s1710_s28 + $0x108] sm:$0xff] }
  0xe0   : > { %3583 = vst [vmem:[#allocation50_spill] sm:$0xff] %v2676_v32  ;;  %3584 = vst [vmem:[#allocation81_spill] sm:$0xff] %v2691_v4  ;;  %v2711_v7 = vld [vmem:[%s1717_s24 + $0x1b0] sm:$0xff]  ;;  %v2714_v38 = vld [vmem:[%s1717_s24 + $0x1b8] sm:$0xff]  ;;  %v2717_v28 = vadd.f32 1.0, %v2649_v19  ;;  %v2720_v6 = vadd.f32 1.0, %v2652_v15 }
  0xe1   : > { %3585 = vst [vmem:[#allocation51_spill] sm:$0xff] %v2694_v62  ;;  %3586 = vst [vmem:[#allocation82_spill] sm:$0xff] %v2711_v7  ;;  %v2723_v34 = vadd.f32 1.0, %v2655_v40  ;;  %v2726_v25 = vadd.f32 1.0, %v2658_v1  ;;  %v1165_v18 = vld [vmem:[%s1710_s28 + $0x110] sm:$0xff]  ;;  %v1166_v53 = vld [vmem:[%s1710_s28 + $0x118] sm:$0xff] }
  0xe2   : > { %3587 = vst [vmem:[#allocation52_spill] sm:$0xff] %v2714_v38  ;;  %v1167_v14 = vld [vmem:[%s1710_s28 + $0x120] sm:$0xff]  ;;  %v2736_v56 = vld [vmem:[%s1717_s24 + $0x1c8] sm:$0xff]  ;;  %v2739_v12 = vld [vmem:[%s1717_s24 + $0x1d0] sm:$0xff]  ;;  %v2742_v39 = vadd.f32 1.0, %v2670_v23  ;;  %v2745_v42 = vadd.f32 1.0, %v2673_v5 }
  0xe3   : > { %3588 = vst [vmem:[#allocation53_spill] sm:$0xff] %v2723_v34  ;;  %3589 = vst [vmem:[#allocation96_spill] sm:$0xff] %v2726_v25  ;;  %v2733_v27 = vld [vmem:[%s1717_s24 + $0x1c0] sm:$0xff]  ;;  %v2748_v43 = vadd.f32 1.0, %v2676_v32  ;;  %v1168_v13 = vld [vmem:[%s1710_s28 + $0x128] sm:$0xff]  ;;  %v2760_v40 = vadd.f32 1.0, %v2691_v4 }
  0xe4   : > { %3590 = vst [vmem:[#allocation54_spill] sm:$0xff] %v2733_v27  ;;  %3591 = vst [vmem:[#allocation97_spill] sm:$0xff] %v2736_v56  ;;  %v1169_v11 = vld [vmem:[%s1710_s28 + $0x130] sm:$0xff]  ;;  %v1170_v36 = vld [vmem:[%s1710_s28 + $0x138] sm:$0xff]  ;;  %v2763_v23 = vadd.f32 1.0, %v2694_v62  ;;  %v2775_v5 = vadd.f32 1.0, %v2733_v27 }
  0xe5   : > { %3592 = vst [vmem:[#allocation55_spill] sm:$0xff] %v2739_v12  ;;  %3593 = vst [vmem:[#allocation72_spill] sm:$0xff] %v2742_v39  ;;  %v2754_v1 = vld [vmem:[%s1717_s24 + $0x1d8] sm:$0xff]  ;;  %v2757_v61 = vld [vmem:[%s1717_s24 + $0x1e0] sm:$0xff]  ;;  %v2778_v4 = vadd.f32 1.0, %v2736_v56  ;;  %v2822_v27 = vmul.f32 %v1169_v11, %v1169_v11 }
  0xe6   : > { %3594 = vst [vmem:[#allocation39_spill] sm:$0xff] %v2745_v42  ;;  %3595 = vst [vmem:[#allocation71_spill] sm:$0xff] %v2748_v43  ;;  %v2766_v42 = vadd.f32 1.0, %v2711_v7  ;;  %v2769_v43 = vadd.f32 1.0, %v2714_v38  ;;  %v2772_v32 = vld [vmem:[%s1717_s24 + $0x1e8] sm:$0xff]  ;;  %v2791_v38 = vadd.f32 1.0, %v2757_v61  ;;  %v2824_v7 = vmul.f32 %v1170_v36, %v1170_v36 }
  0xe7   : > { %3596 = vst [vmem:[#allocation100_spill] sm:$0xff] %v2754_v1  ;;  %3597 = vst [vmem:[#allocation56_spill] sm:$0xff] %v2757_v61  ;;  %v2810_v61 = vmul.f32 %v1165_v18, %v1165_v18  ;;  %v1181_v18 = vld [vmem:[%s1710_s28 + $0x190] sm:$0xff]  ;;  %v1182_v39 = vld [vmem:[%s1710_s28 + $0x198] sm:$0xff] }
  0xe8   : > { %3598 = vst [vmem:[#allocation77_spill] sm:$0xff] %v2760_v40  ;;  %3599 = vst [vmem:[#allocation78_spill] sm:$0xff] %v2763_v23  ;;  %v2781_v40 = vadd.f32 1.0, %v2739_v12  ;;  %v806_v23 = vmul.f32 1.442695, %v2562_v8  ;;  %v1171_v12 = vld [vmem:[%s1710_s28 + $0x140] sm:$0xff]  ;;  %v2863_v21 = vmul.f32 %v1182_v39, %v1182_v39 }
  0xe9   : > { %3600 = vst [vmem:[#allocation101_spill] sm:$0xff] %v2766_v42  ;;  %3601 = vst [vmem:[#allocation57_spill] sm:$0xff] %v2769_v43  ;;  %v2785_v42 = vld [vmem:[%s1717_s24 + $0x1f0] sm:$0xff]  ;;  %v2788_v43 = vadd.f32 1.0, %v2754_v1  ;;  %v1172_v8 = vld [vmem:[%s1710_s28 + $0x148] sm:$0xff]  ;;  %v2803_v1 = vmul.f32 %v1163_v58, %v1163_v58  ;;  %v2829_v62 = vmul.f32 %v1171_v12, %v1171_v12 }
  0xea   : > { %3602 = vst [vmem:[#allocation79_spill] sm:$0xff] %v2772_v32  ;;  %3603 = vst [vmem:[#allocation84_spill] sm:$0xff] %v2775_v5  ;;  %v2794_v5 = vadd.f32 1.0, %v2772_v32  ;;  %v2801_v56 = vadd.f32 1.0, %v2785_v42  ;;  %v1175_v32 = vld [vmem:[%s1710_s28 + $0x160] sm:$0xff]  ;;  %v1177_v58 = vld [vmem:[%s1710_s28 + $0x170] sm:$0xff]  ;;  %1342 = vpow2.f32 %v806_v23 }
  0xeb   : > { %3604 = vst [vmem:[#allocation102_spill] sm:$0xff] %v2778_v4  ;;  %3605 = vst [vmem:[#allocation58_spill] sm:$0xff] %v2781_v40  ;;  %v808_v4 = vmul.f32 1.442695, %v2565_v59  ;;  %v622_v40 = vadd.f32 %v621_v3, %v2525_v45  ;;  %v2812_v59 = vmul.f32 %v1166_v53, %v1166_v53  ;;  %v2814_v3 = vmul.f32 %v1167_v14, %v1167_v14  ;;  %v1179_v53 = vld [vmem:[%s1710_s28 + $0x180] sm:$0xff]  ;;  %v1180_v14 = vld [vmem:[%s1710_s28 + $0x188] sm:$0xff] }
  0xec   : > { %3606 = vst [vmem:[#allocation104_spill] sm:$0xff] %v2785_v42  ;;  %3607 = vst [vmem:[#allocation59_spill] sm:$0xff] %v2788_v43  ;;  %v2805_v43 = vmul.f32 %v1164_v46, %v1164_v46  ;;  %v810_v45 = vmul.f32 1.442695, %v2586_v24  ;;  %v1178_v42 = vld [vmem:[%s1710_s28 + $0x178] sm:$0xff]  ;;  %v2820_v46 = vmul.f32 %v1168_v13, %v1168_v13  ;;  %v2831_v24 = vmul.f32 %v1172_v8, %v1172_v8  ;;  %v1183_v36 = vld [vmem:[%s1710_s28 + $0x1a0] sm:$0xff] }
  0xed   : > { %3608 = vst [vmem:[#allocation105_spill] sm:$0xff] %v2791_v38  ;;  %3609 = vst [vmem:[#allocation60_spill] sm:$0xff] %v2794_v5  ;;  %v1173_v38 = vld [vmem:[%s1710_s28 + $0x150] sm:$0xff]  ;;  %v1174_v5 = vld [vmem:[%s1710_s28 + $0x158] sm:$0xff]  ;;  %1344 = vpow2.f32 %v808_v4  ;;  %v812_v13 = vmul.f32 1.442695, %v2589_v30  ;;  %v623_v11 = vadd.f32 %v622_v40, %v2530_v31  ;;  %v2841_v15 = vmul.f32 %v1175_v32, %v1175_v32 }
  0xee   : > { %3610 = vst [vmem:[#allocation108_spill] sm:$0xff] %v2801_v56  ;;  %v1176_v56 = vld [vmem:[%s1710_s28 + $0x168] sm:$0xff]  ;;  %v2837_v25 = vmul.f32 %v1173_v38, %v1173_v38  ;;  %v2839_v23 = vmul.f32 %v1174_v5, %v1174_v5  ;;  %v1185_v8 = vld [vmem:[%s1710_s28 + $0x1b0] sm:$0xff]  ;;  %v1186_v0 = vld [vmem:[%s1710_s28 + $0x1b8] sm:$0xff]  ;;  %v2848_v4 = vmul.f32 %v1177_v58, %v1177_v58  ;;  %1346 = vpow2.f32 %v810_v45 }
  0xef   : > { %v1184_v12 = vld [vmem:[%s1710_s28 + $0x1a8] sm:$0xff]  ;;  %v2846_v19 = vmul.f32 %v1176_v56, %v1176_v56  ;;  %v814_v31 = vmul.f32 1.442695, %v2592_v35  ;;  %v1187_v30 = vld [vmem:[%s1710_s28 + $0x1c0] sm:$0xff]  ;;  %v2853_v38 = vmul.f32 %v1178_v42, %v1178_v42  ;;  %v2855_v34 = vmul.f32 %v1179_v53, %v1179_v53  ;;  %v1189_v55 = vld [vmem:[%s1710_s28 + $0x1d0] sm:$0xff] }
  0xf0   : > { %v1188_v40 = vld [vmem:[%s1710_s28 + $0x1c8] sm:$0xff]  ;;  %v2857_v5 = vmul.f32 %v1180_v14, %v1180_v14  ;;  %v2859_v32 = vmul.f32 %v1181_v18, %v1181_v18  ;;  %v1190_v22 = vld [vmem:[%s1710_s28 + $0x1d8] sm:$0xff]  ;;  %v2865_v56 = vmul.f32 %v1183_v36, %v1183_v36  ;;  %1348 = vpow2.f32 %v812_v13 }
  0xf1   : > { %v816_v45 = vmul.f32 1.442695, %v2611_v16  ;;  %v624_v35 = vadd.f32 %v623_v11, %v2539_v63  ;;  %v2869_v58 = vmul.f32 %v1184_v12, %v1184_v12  ;;  %v2871_v42 = vmul.f32 %v1185_v8, %v1185_v8 }
  0xf2   : > { %v2873_v53 = vmul.f32 %v1186_v0, %v1186_v0  ;;  %v2875_v14 = vmul.f32 %v1187_v30, %v1187_v30  ;;  %v2877_v18 = vmul.f32 %v1188_v40, %v1188_v40  ;;  %1350 = vpow2.f32 %v814_v31 }
  0xf3   : > { %v818_v39 = vmul.f32 1.442695, %v2614_v47  ;;  %v2880_v36 = vmul.f32 %v1189_v55, %v1189_v55  ;;  %v2882_v13 = vmul.f32 %v1190_v22, %v1190_v22  ;;  %v774_v63 = vsub.f32 %v2643_v17, %v2803_v1  ;;  %v3611_v1 = vld [vmem:[#allocation11_spill] sm:$0xff] }
  0xf4   : > { %v775_v16 = vsub.f32 %v2646_v48, %v2805_v43  ;;  %v776_v0 = vsub.f32 %v2661_v44, %v2810_v61  ;;  %v777_v11 = vsub.f32 %v2664_v10, %v2812_v59  ;;  %1352 = vpow2.f32 %v816_v45  ;;  %v1343_v47 = vpop.eup %1342  ;;  %v3612_v44 = vld [vmem:[#allocation43_spill] sm:$0xff] }
  0xf5   : > { %v820_v12 = vmul.f32 1.442695, %v2617_v26  ;;  %v625_v55 = vadd.f32 %v624_v35, %v2543_v20  ;;  %v778_v22 = vsub.f32 %v2667_v37, %v2814_v3  ;;  %v779_v17 = vsub.f32 %v2679_v29, %v2820_v46  ;;  %v3613_v26 = vld [vmem:[#allocation12_spill] sm:$0xff]  ;;  %v3614_v46 = vld [vmem:[#allocation13_spill] sm:$0xff] }
  0xf6   : > { %v780_v43 = vsub.f32 %v2682_v33, %v2822_v27  ;;  %1354 = vpow2.f32 %v818_v39  ;;  %v822_v61 = vmul.f32 1.442695, %v2620_v50  ;;  %v904_v10 = vadd.s32 %v3612_v44, %v3611_v1  ;;  %v3615_v39 = vld [vmem:[#allocation14_spill] sm:$0xff]  ;;  %v3620_v50 = vld [vmem:[#allocation16_spill] sm:$0xff] }
  0xf7   : > { %v1345_v48 = vpop.eup %1344  ;;  %v905_v59 = vadd.s32 %v3612_v44, %v3613_v26  ;;  %v781_v20 = vsub.f32 %v2685_v52, %v2824_v7  ;;  %v782_v37 = vsub.f32 %v2688_v49, %v2829_v62  ;;  %v783_v29 = vsub.f32 %v2697_v54, %v2831_v24  ;;  %v3635_v7 = vld [vmem:[#allocation21_spill] sm:$0xff]  ;;  %v3638_v49 = vld [vmem:[#allocation22_spill] sm:$0xff]  ;;  %v3642_v24 = vld [vmem:[#allocation23_spill] sm:$0xff] }
  0xf8   : > { %v1347_v33 = vpop.eup %1346  ;;  %1356 = vpow2.f32 %v820_v12  ;;  %v824_v3 = vmul.f32 1.442695, %v2631_v9  ;;  %v906_v8 = vadd.s32 %v3612_v44, %v3614_v46  ;;  %v626_v31 = vadd.f32 %v625_v55, %v2547_v60  ;;  %v3619_v9 = vld [vmem:[#allocation47_spill] sm:$0xff] }
  0xf9   : > { %v826_v30 = vmul.f32 1.442695, %v2634_v51  ;;  %v870_v40 = vsub.f32 %v774_v63, %v1343_v47  ;;  %v871_v45 = vsub.f32 %v775_v16, %v1345_v48  ;;  %1358 = vpow2.f32 %v822_v61  ;;  %v3616_v63 = vld [vmem:[#allocation73_spill] sm:$0xff]  ;;  %v3617_v47 = vld [vmem:[#allocation15_spill] sm:$0xff] }
  0xfa   : > { %v1349_v35 = vpop.eup %1348  ;;  %v907_v1 = vadd.s32 %v3612_v44, %v3615_v39  ;;  %vm936_vm13 = vcmp.lt.s32.totalorder %v904_v10, 1000  ;;  %vm937_vm14 = vcmp.lt.s32.totalorder %v905_v59, 1000  ;;  %v872_v55 = vsub.f32 %v776_v0, %v1347_v33  ;;  %v3618_v61 = vld [vmem:[#allocation93_spill] sm:$0xff] }
  0xfb   : > { %1360 = vpow2.f32 %v824_v3  ;;  %v828_v16 = vmul.f32 1.442695, %v3616_v63  ;;  %v908_v48 = vadd.s32 %v3612_v44, %v3617_v47  ;;  %vm938_vm15 = vcmp.lt.s32.totalorder %v906_v8, 1000  ;;  %v3621_v33 = vld [vmem:[#allocation53_spill] sm:$0xff]  ;;  %v3622_v63 = vld [vmem:[#allocation83_spill] sm:$0xff]  ;;  %v3626_v3 = vld [vmem:[#allocation18_spill] sm:$0xff] }
  0xfc   : > { %v1351_v51 = vpop.eup %1350  ;;  %v627_v10 = vadd.f32 %v626_v31, %v3618_v61  ;;  %v873_v26 = vsub.f32 %v777_v11, %v1349_v35  ;;  %v968_v59 = vsel %vm936_vm13, %v870_v40, 0.0  ;;  %v969_v46 = vsel %vm937_vm14, %v871_v45, 0.0  ;;  %v3623_v11 = vld [vmem:[#allocation17_spill] sm:$0xff]  ;;  %v3624_v40 = vld [vmem:[#allocation94_spill] sm:$0xff] }
  0xfd   : > { %1362 = vpow2.f32 %v826_v30  ;;  %v830_v12 = vmul.f32 1.442695, %v3619_v9  ;;  %v909_v0 = vadd.s32 %v3612_v44, %v3620_v50  ;;  %vm939_vm0 = vcmp.lt.s32.totalorder %v907_v1, 1000  ;;  %v3625_v35 = vld [vmem:[#allocation74_spill] sm:$0xff] }
  0xfe   : > { %v1353_v39 = vpop.eup %1352  ;;  %v832_v60 = vmul.f32 1.442695, %v3622_v63  ;;  %v874_v47 = vsub.f32 %v778_v22, %v1351_v51  ;;  %v970_v8 = vsel %vm938_vm15, %v872_v55, 0.0  ;;  %1364 = vpow2.f32 %v828_v16  ;;  %v3627_v55 = vld [vmem:[#allocation96_spill] sm:$0xff] }
  0xff   : > { %v910_v31 = vadd.s32 %v3612_v44, %v3623_v11  ;;  %vm940_vm1 = vcmp.lt.s32.totalorder %v908_v48, 1000  ;;  %v1000_v30 = vadd.f32 %v969_v46, %v968_v59  ;;  %v628_v45 = vadd.f32 %v627_v10, %v3624_v40  ;;  %v3628_v16 = vld [vmem:[#allocation48_spill] sm:$0xff]  ;;  %v3629_v10 = vld [vmem:[#allocation19_spill] sm:$0xff] }
 0x100   : > { %v1355_v27 = vpop.eup %1354  ;;  %v834_v9 = vmul.f32 1.442695, %v3625_v35  ;;  %v875_v50 = vsub.f32 %v779_v17, %v1353_v39  ;;  %v971_v1 = vsel %vm939_vm0, %v873_v26, 0.0  ;;  %1366 = vpow2.f32 %v830_v12  ;;  %v3630_v12 = vld [vmem:[#allocation95_spill] sm:$0xff]  ;;  %v3634_v35 = vld [vmem:[#allocation49_spill] sm:$0xff] }
 0x101   : > { %v911_v63 = vadd.s32 %v3612_v44, %v3626_v3  ;;  %vm941_vm2 = vcmp.lt.s32.totalorder %v909_v0, 1000  ;;  %v1001_v22 = vadd.f32 %v1000_v30, %v970_v8  ;;  %v790_v51 = vsub.f32 %v3627_v55, %v2855_v34  ;;  %v3631_v40 = vld [vmem:[#allocation75_spill] sm:$0xff]  ;;  %v3668_v34 = vld [vmem:[#allocation30_spill] sm:$0xff] }
 0x102   : > { %v1357_v61 = vpop.eup %1356  ;;  %v836_v11 = vmul.f32 1.442695, %v3628_v16  ;;  %v876_v48 = vsub.f32 %v780_v43, %v1355_v27  ;;  %v972_v59 = vsel %vm940_vm1, %v874_v47, 0.0  ;;  %1368 = vpow2.f32 %v832_v60  ;;  %v3632_v43 = vld [vmem:[#allocation20_spill] sm:$0xff] }
 0x103   : > { %v1359_v46 = vpop.eup %1358  ;;  %v912_v17 = vadd.s32 %v3612_v44, %v3629_v10  ;;  %vm942_vm3 = vcmp.lt.s32.totalorder %v910_v31, 1000  ;;  %v1002_v26 = vadd.f32 %v1001_v22, %v971_v1  ;;  %v629_v39 = vadd.f32 %v628_v45, %v3630_v12  ;;  %v3633_v47 = vld [vmem:[#allocation72_spill] sm:$0xff] }
 0x104   : > { %v838_v3 = vmul.f32 1.442695, %v3631_v40  ;;  %v877_v0 = vsub.f32 %v781_v20, %v1357_v61  ;;  %v973_v8 = vsel %vm941_vm2, %v875_v50, 0.0  ;;  %1370 = vpow2.f32 %v834_v9  ;;  %v3636_v50 = vld [vmem:[#allocation99_spill] sm:$0xff] }
 0x105   : > { %v1361_v30 = vpop.eup %1360  ;;  %v913_v27 = vadd.s32 %v3612_v44, %v3632_v43  ;;  %vm943_vm4 = vcmp.lt.s32.totalorder %v911_v63, 1000  ;;  %v1003_v60 = vadd.f32 %v1002_v26, %v972_v59  ;;  %v791_v31 = vsub.f32 %v3633_v47, %v2857_v5  ;;  %v3637_v63 = vld [vmem:[#allocation80_spill] sm:$0xff]  ;;  %v3671_v47 = vld [vmem:[#allocation31_spill] sm:$0xff] }
 0x106   : > { %v840_v1 = vmul.f32 1.442695, %v3634_v35  ;;  %v878_v45 = vsub.f32 %v782_v37, %v1359_v46  ;;  %v974_v22 = vsel %vm942_vm3, %v876_v48, 0.0  ;;  %1372 = vpow2.f32 %v836_v11  ;;  %v3639_v11 = vld [vmem:[#allocation39_spill] sm:$0xff]  ;;  %v3640_v46 = vld [vmem:[#allocation50_spill] sm:$0xff] }
 0x107   : > { %v1363_v52 = vpop.eup %1362  ;;  %v914_v20 = vadd.s32 %v3612_v44, %v3635_v7  ;;  %vm944_vm5 = vcmp.lt.s32.totalorder %v912_v17, 1000  ;;  %v1004_v9 = vadd.f32 %v1003_v60, %v973_v8  ;;  %v630_v61 = vadd.f32 %v629_v39, %v3636_v50  ;;  %v3648_v7 = vld [vmem:[#allocation51_spill] sm:$0xff] }
 0x108   : > { %v842_v16 = vmul.f32 1.442695, %v3637_v63  ;;  %v879_v59 = vsub.f32 %v783_v29, %v1361_v30  ;;  %v975_v10 = vsel %vm943_vm4, %v877_v0, 0.0  ;;  %v1365_v26 = vpop.eup %1364  ;;  %1374 = vpow2.f32 %v838_v3  ;;  %v3643_v0 = vld [vmem:[#allocation103_spill] sm:$0xff]  ;;  %v3644_v30 = vld [vmem:[#allocation81_spill] sm:$0xff] }
 0x109   : > { %v915_v62 = vadd.s32 %v3612_v44, %v3638_v49  ;;  %vm945_vm6 = vcmp.lt.s32.totalorder %v913_v27, 1000  ;;  %v1005_v37 = vadd.f32 %v1004_v9, %v974_v22  ;;  %v792_v48 = vsub.f32 %v3639_v11, %v2859_v32  ;;  %v3674_v11 = vld [vmem:[#allocation32_spill] sm:$0xff] }
 0x10a   : > { %v844_v17 = vmul.f32 1.442695, %v3640_v46  ;;  %v3641_v12 = vsub.f32 %v2700_v57, %v2837_v25  ;;  %v976_v40 = vsel %vm944_vm5, %v878_v45, 0.0  ;;  %v1367_v54 = vpop.eup %1366  ;;  %1376 = vpow2.f32 %v840_v1  ;;  %v3646_v25 = vld [vmem:[#allocation24_spill] sm:$0xff]  ;;  %v3647_v45 = vld [vmem:[#allocation71_spill] sm:$0xff] }
 0x10b   : > { %v916_v29 = vadd.s32 %v3612_v44, %v3642_v24  ;;  %vm946_vm7 = vcmp.lt.s32.totalorder %v914_v20, 1000  ;;  %v1006_v3 = vadd.f32 %v1005_v37, %v975_v10  ;;  %v631_v8 = vadd.f32 %v630_v61, %v3643_v0 }
 0x10c   : > { %v880_v39 = vsub.f32 %v3641_v12, %v1363_v52  ;;  %v846_v43 = vmul.f32 1.442695, %v3644_v30  ;;  %v3645_v27 = vsub.f32 %v2703_v2, %v2839_v23  ;;  %v977_v35 = vsel %vm945_vm6, %v879_v59, 0.0  ;;  %v1369_v22 = vpop.eup %1368  ;;  %v3650_v23 = vld [vmem:[#allocation25_spill] sm:$0xff]  ;;  %v3651_v59 = vld [vmem:[#allocation63_spill] sm:$0xff] }
 0x10d   : > { %1378 = vpow2.f32 %v842_v16  ;;  %v917_v57 = vadd.s32 %v3612_v44, %v3646_v25  ;;  %vm947_vm8 = vcmp.lt.s32.totalorder %v915_v62, 1000  ;;  %v1007_v1 = vadd.f32 %v1006_v3, %v976_v40 }
 0x10e   : > { %v881_v60 = vsub.f32 %v3645_v27, %v1365_v26  ;;  %v793_v52 = vsub.f32 %v3647_v45, %v2863_v21  ;;  %v848_v20 = vmul.f32 1.442695, %v3648_v7  ;;  %v3649_v9 = vsub.f32 %v2706_v41, %v2841_v15  ;;  %v1371_v2 = vpop.eup %1370  ;;  %v3652_v26 = vld [vmem:[#allocation82_spill] sm:$0xff]  ;;  %v3677_v21 = vld [vmem:[#allocation33_spill] sm:$0xff] }
 0x10f   : > { %v978_v61 = vsel %vm946_vm7, %v880_v39, 0.0  ;;  %1380 = vpow2.f32 %v844_v17  ;;  %v918_v63 = vadd.s32 %v3612_v44, %v3650_v23  ;;  %vm948_vm9 = vcmp.lt.s32.totalorder %v916_v29, 1000  ;;  %v3654_v15 = vld [vmem:[#allocation26_spill] sm:$0xff]  ;;  %v3655_v39 = vld [vmem:[#allocation77_spill] sm:$0xff] }
 0x110   : > { %v882_v50 = vsub.f32 %v3649_v9, %v1367_v54  ;;  %v1008_v16 = vadd.f32 %v1007_v1, %v977_v35  ;;  %v632_v10 = vadd.f32 %v631_v8, %v3651_v59  ;;  %v850_v49 = vmul.f32 1.442695, %v3652_v26  ;;  %v1373_v12 = vpop.eup %1372  ;;  %v3656_v54 = vld [vmem:[#allocation52_spill] sm:$0xff]  ;;  %v3663_v7 = vld [vmem:[#allocation78_spill] sm:$0xff]  ;;  %v3664_v9 = vld [vmem:[#allocation97_spill] sm:$0xff] }
 0x111   : > { %v3653_v62 = vsub.f32 %v2717_v28, %v2846_v19  ;;  %v979_v46 = vsel %vm947_vm8, %v881_v60, 0.0  ;;  %1382 = vpow2.f32 %v846_v43  ;;  %v919_v41 = vadd.s32 %v3612_v44, %v3654_v15  ;;  %v3658_v28 = vld [vmem:[#allocation27_spill] sm:$0xff]  ;;  %v3659_v43 = vld [vmem:[#allocation45_spill] sm:$0xff]  ;;  %v3660_v60 = vld [vmem:[#allocation54_spill] sm:$0xff] }
 0x112   : > { %vm949_vm10 = vcmp.lt.s32.totalorder %v917_v57, 1000  ;;  %v1009_v17 = vadd.f32 %v1008_v16, %v978_v61  ;;  %v794_v40 = vsub.f32 %v3655_v39, %v2865_v56  ;;  %v852_v24 = vmul.f32 1.442695, %v3656_v54  ;;  %v1375_v19 = vpop.eup %1374  ;;  %v3666_v16 = vld [vmem:[#allocation67_spill] sm:$0xff]  ;;  %v3672_v54 = vld [vmem:[#allocation46_spill] sm:$0xff] }
 0x113   : > { %v883_v37 = vsub.f32 %v3653_v62, %v1369_v22  ;;  %v3657_v29 = vsub.f32 %v2720_v6, %v2848_v4  ;;  %v980_v0 = vsel %vm948_vm9, %v882_v50, 0.0  ;;  %1384 = vpow2.f32 %v848_v20  ;;  %v3662_v6 = vld [vmem:[#allocation28_spill] sm:$0xff] }
 0x114   : > { %v920_v8 = vadd.s32 %v3612_v44, %v3658_v28  ;;  %vm950_vm11 = vcmp.lt.s32.totalorder %v918_v63, 1000  ;;  %v1010_v30 = vadd.f32 %v1009_v17, %v979_v46  ;;  %v633_v27 = vadd.f32 %v632_v10, %v3659_v43  ;;  %v1377_v57 = vpop.eup %1376  ;;  %v3667_v10 = vld [vmem:[#allocation55_spill] sm:$0xff]  ;;  %v3675_v28 = vld [vmem:[#allocation57_spill] sm:$0xff] }
 0x115   : > { %v884_v3 = vsub.f32 %v3657_v29, %v1371_v2  ;;  %v854_v35 = vmul.f32 1.442695, %v3660_v60  ;;  %v3661_v56 = vsub.f32 %v3621_v33, %v2853_v38  ;;  %v981_v25 = vsel %vm949_vm10, %v883_v37, 0.0  ;;  %v3665_v33 = vld [vmem:[#allocation29_spill] sm:$0xff]  ;;  %v3673_v29 = vld [vmem:[#allocation56_spill] sm:$0xff] }
 0x116   : > { %1386 = vpow2.f32 %v850_v49  ;;  %v921_v4 = vadd.s32 %v3612_v44, %v3662_v6  ;;  %vm951_vm12 = vcmp.lt.s32.totalorder %v919_v41, 1000  ;;  %v1011_v1 = vadd.f32 %v1010_v30, %v980_v0  ;;  %v3669_v37 = vld [vmem:[#allocation101_spill] sm:$0xff]  ;;  %v3676_v30 = vld [vmem:[#allocation79_spill] sm:$0xff] }
 0x117   : > { %v885_v22 = vsub.f32 %v3661_v56, %v1373_v12  ;;  %v795_v20 = vsub.f32 %v3663_v7, %v2869_v58  ;;  %v856_v50 = vmul.f32 1.442695, %v3664_v9  ;;  %v886_v61 = vsub.f32 %v790_v51, %v1375_v19  ;;  %v1379_v38 = vpop.eup %1378  ;;  %v3670_v12 = vld [vmem:[#allocation100_spill] sm:$0xff]  ;;  %v3680_v7 = vld [vmem:[#allocation34_spill] sm:$0xff] }
 0x118   : > { %v982_v2 = vsel %vm950_vm11, %v884_v3, 0.0  ;;  %1388 = vpow2.f32 %v852_v24  ;;  %v922_v23 = vadd.s32 %v3612_v44, %v3665_v33  ;;  %vm952_vm13 = vcmp.lt.s32.totalorder %v920_v8, 1000  ;;  %v1226_v56 = vld [vmem:[%s1717_s24 + $0x1f8] sm:$0xff] }
 0x119   : > { %v1012_v63 = vadd.f32 %v1011_v1, %v981_v25  ;;  %v634_v59 = vadd.f32 %v633_v27, %v3666_v16  ;;  %v858_v26 = vmul.f32 1.442695, %v3667_v10  ;;  %v887_v58 = vsub.f32 %v791_v31, %v1377_v57  ;;  %v1381_v62 = vpop.eup %1380  ;;  %v3679_v57 = vld [vmem:[#allocation104_spill] sm:$0xff]  ;;  %v1191_v16 = vld [vmem:[%s1710_s28 + $0x1e0] sm:$0xff] }
 0x11a   : > { %v983_v49 = vsel %vm951_vm12, %v885_v22, 0.0  ;;  %1390 = vpow2.f32 %v854_v35  ;;  %v923_v55 = vadd.s32 %v3612_v44, %v3668_v34  ;;  %vm953_vm14 = vcmp.lt.s32.totalorder %v921_v4, 1000  ;;  %v3678_v22 = vld [vmem:[#allocation70_spill] sm:$0xff] }
 0x11b   : > { %v1013_v51 = vadd.f32 %v1012_v63, %v982_v2  ;;  %v796_v46 = vsub.f32 %v3669_v37, %v2871_v42  ;;  %v860_v15 = vmul.f32 1.442695, %v3670_v12  ;;  %v888_v41 = vsub.f32 %v792_v48, %v1379_v38  ;;  %v1383_v5 = vpop.eup %1382  ;;  %v3682_v63 = vld [vmem:[#allocation88_spill] sm:$0xff] }
 0x11c   : > { %v984_v17 = vsel %vm952_vm13, %v886_v61, 0.0  ;;  %1392 = vpow2.f32 %v856_v50  ;;  %v924_v31 = vadd.s32 %v3612_v44, %v3671_v47  ;;  %vm954_vm15 = vcmp.lt.s32.totalorder %v922_v23, 1000  ;;  %v3681_v50 = vld [vmem:[#allocation84_spill] sm:$0xff] }
 0x11d   : > { %v1014_v39 = vadd.f32 %v1013_v51, %v983_v49  ;;  %v635_v24 = vadd.f32 %v634_v59, %v3672_v54  ;;  %v862_v3 = vmul.f32 1.442695, %v3673_v29  ;;  %v889_v42 = vsub.f32 %v793_v52, %v1381_v62  ;;  %v1385_v32 = vpop.eup %1384  ;;  %v3685_v49 = vld [vmem:[#allocation102_spill] sm:$0xff]  ;;  %v3686_v37 = vld [vmem:[#allocation36_spill] sm:$0xff] }
 0x11e   : > { %v985_v0 = vsel %vm953_vm14, %v887_v58, 0.0  ;;  %1394 = vpow2.f32 %v858_v26  ;;  %v925_v48 = vadd.s32 %v3612_v44, %v3674_v11  ;;  %vm955_vm0 = vcmp.lt.s32.totalorder %v923_v55, 1000  ;;  %v3684_v26 = vld [vmem:[#allocation76_spill] sm:$0xff]  ;;  %v1192_v51 = vld [vmem:[%s1710_s28 + $0x1e8] sm:$0xff] }
 0x11f   : > { %v1015_v19 = vadd.f32 %v1014_v39, %v984_v17  ;;  %v797_v8 = vsub.f32 %v3675_v28, %v2873_v53  ;;  %v864_v43 = vmul.f32 1.442695, %v3676_v30  ;;  %v890_v27 = vsub.f32 %v794_v40, %v1383_v5  ;;  %v3688_v39 = vld [vmem:[#allocation37_spill] sm:$0xff]  ;;  %v3691_v28 = vld [vmem:[#allocation38_spill] sm:$0xff] }
 0x120   : > { %v986_v60 = vsel %vm954_vm15, %v888_v41, 0.0  ;;  %v1387_v35 = vpop.eup %1386  ;;  %1396 = vpow2.f32 %v860_v15  ;;  %v926_v45 = vadd.s32 %v3612_v44, %v3677_v21  ;;  %vm956_vm1 = vcmp.lt.s32.totalorder %v924_v31, 1000  ;;  %v3687_v41 = vld [vmem:[#allocation58_spill] sm:$0xff] }
 0x121   : > { %v1016_v52 = vadd.f32 %v1015_v19, %v985_v0  ;;  %v636_v25 = vadd.f32 %v635_v24, %v3678_v22  ;;  %v866_v6 = vmul.f32 1.442695, %v3679_v57  ;;  %v891_v4 = vsub.f32 %v795_v20, %v1385_v32  ;;  %v3683_v20 = vld [vmem:[#allocation35_spill] sm:$0xff]  ;;  %v3693_v22 = vld [vmem:[#allocation40_spill] sm:$0xff] }
 0x122   : > { %v987_v1 = vsel %vm955_vm0, %v889_v42, 0.0  ;;  %v1389_v53 = vpop.eup %1388  ;;  %1398 = vpow2.f32 %v862_v3  ;;  %v927_v40 = vadd.s32 %v3612_v44, %v3680_v7  ;;  %vm957_vm2 = vcmp.lt.s32.totalorder %v925_v48, 1000  ;;  %v3689_v3 = vld [vmem:[#allocation59_spill] sm:$0xff]  ;;  %v3690_v48 = vld [vmem:[#allocation106_spill] sm:$0xff] }
 0x123   : > { %v1017_v9 = vadd.f32 %v1016_v52, %v986_v60  ;;  %v798_v61 = vsub.f32 %v3681_v50, %v2875_v14  ;;  %v868_v2 = vmul.f32 1.442695, %v1226_v56  ;;  %v892_v38 = vsub.f32 %v796_v46, %v1387_v35  ;;  %v3696_v50 = vld [vmem:[#allocation41_spill] sm:$0xff] }
 0x124   : > { %v988_v33 = vsel %vm956_vm1, %v890_v27, 0.0  ;;  %v1391_v23 = vpop.eup %1390  ;;  %vm577_vm3 = vcmp.lt.s32.totalorder %v3682_v63, 1000  ;;  %1400 = vpow2.f32 %v864_v43  ;;  %v928_v59 = vadd.s32 %v3612_v44, %v3683_v20  ;;  %v3692_v27 = vld [vmem:[#allocation105_spill] sm:$0xff] }
 0x125   : > { %vm958_vm4 = vcmp.lt.s32.totalorder %v926_v45, 1000  ;;  %v1018_v10 = vadd.f32 %v1017_v9, %v987_v1  ;;  %v637_v58 = vadd.f32 %v636_v25, %v3684_v26  ;;  %v799_v14 = vsub.f32 %v3685_v49, %v2877_v18  ;;  %v1193_v18 = vld [vmem:[%s1710_s28 + $0x1f0] sm:$0xff]  ;;  %v3700_v26 = vld [vmem:[#allocation42_spill] sm:$0xff] }
 0x126   : > { %v893_v62 = vsub.f32 %v797_v8, %v1389_v53  ;;  %v989_v34 = vsel %vm957_vm2, %v891_v4, 0.0  ;;  %v1393_v55 = vpop.eup %1392  ;;  %1402 = vpow2.f32 %v866_v6  ;;  %v929_v46 = vadd.s32 %v3612_v44, %v3686_v37  ;;  %v3694_v6 = vld [vmem:[#allocation60_spill] sm:$0xff] }
 0x127   : > { %vm959_vm5 = vcmp.lt.s32.totalorder %v927_v40, 1000  ;;  %v1019_v12 = vadd.f32 %v1018_v10, %v988_v33  ;;  %v770_v15 = vmul.f32 %v1191_v16, %v1191_v16  ;;  %v800_v17 = vsub.f32 %v3687_v41, %v2880_v36  ;;  %v1194_v36 = vld [vmem:[%s1710_s28 + $0x1f8] sm:$0xff]  ;;  %v3695_v40 = vld [vmem:[#allocation107_spill] sm:$0xff]  ;;  %v3699_v10 = vld [vmem:[#allocation89_spill] sm:$0xff] }
 0x128   : > { %v894_v5 = vsub.f32 %v798_v61, %v1391_v23  ;;  %v990_v47 = vsel %vm958_vm4, %v892_v38, 0.0  ;;  %v1395_v31 = vpop.eup %1394  ;;  %1404 = vpow2.f32 %v868_v2  ;;  %v930_v54 = vadd.s32 %v3612_v44, %v3688_v39  ;;  %v3697_v38 = vld [vmem:[#allocation91_spill] sm:$0xff]  ;;  %v3698_v33 = vld [vmem:[#allocation108_spill] sm:$0xff]  ;;  %v3704_v41 = vld [vmem:[#allocation69_spill] sm:$0xff] }
 0x129   : > { %vm960_vm6 = vcmp.lt.s32.totalorder %v928_v59, 1000  ;;  %v1020_v24 = vadd.f32 %v1019_v12, %v989_v34  ;;  %v771_v29 = vmul.f32 %v1192_v51, %v1192_v51  ;;  %v801_v42 = vsub.f32 %v3689_v3, %v2882_v13  ;;  %v3701_v37 = vld [vmem:[#allocation44_spill] sm:$0xff]  ;;  %v3702_v12 = vld [vmem:[#allocation98_spill] sm:$0xff] }
 0x12a   : > { %v895_v0 = vsub.f32 %v799_v14, %v1393_v55  ;;  %v991_v32 = vsel %vm959_vm5, %v893_v62, 0.0  ;;  %v1397_v11 = vpop.eup %1396  ;;  %v638_v19 = vadd.f32 %v637_v58, %v3690_v48  ;;  %v931_v8 = vadd.s32 %v3612_v44, %v3691_v28 }
 0x12b   : > { %vm961_vm7 = vcmp.lt.s32.totalorder %v929_v46, 1000  ;;  %v1021_v30 = vadd.f32 %v1020_v24, %v990_v47  ;;  %v772_v43 = vmul.f32 %v1193_v18, %v1193_v18  ;;  %v802_v60 = vsub.f32 %v3692_v27, %v770_v15  ;;  %v3703_v15 = vld [vmem:[#allocation114_spill] sm:$0xff]  ;;  %v3706_v47 = vld [vmem:[#allocation92_spill] sm:$0xff] }
 0x12c   : > { %v896_v35 = vsub.f32 %v800_v17, %v1395_v31  ;;  %v992_v21 = vsel %vm960_vm6, %v894_v5, 0.0  ;;  %v1399_v45 = vpop.eup %1398  ;;  %v741_v52 = vadd.f32 1.0, %v1226_v56  ;;  %v932_v13 = vadd.s32 %v3612_v44, %v3693_v22 }
 0x12d   : > { %vm962_vm8 = vcmp.lt.s32.totalorder %v930_v54, 1000  ;;  %v1022_v25 = vadd.f32 %v1021_v30, %v991_v32  ;;  %v773_v57 = vmul.f32 %v1194_v36, %v1194_v36  ;;  %v803_v4 = vsub.f32 %v3694_v6, %v771_v29  ;;  %v3707_v54 = vld [vmem:[#allocation90_spill] sm:$0xff] }
 0x12e   : > { %v897_v1 = vsub.f32 %v801_v42, %v1397_v11  ;;  %v993_v53 = vsel %vm961_vm7, %v895_v0, 0.0  ;;  %v1401_v7 = vpop.eup %1400  ;;  %v639_v9 = vadd.f32 %v638_v19, %v3695_v40  ;;  %v933_v61 = vadd.s32 %v3612_v44, %v3696_v50 }
 0x12f   : > { %vm963_vm9 = vcmp.lt.s32.totalorder %v931_v8, 1000  ;;  %v1023_v2 = vadd.f32 %v1022_v25, %v992_v21  ;;  %v609_v56 = vsel %vm577_vm3, %v3697_v38, 0.0  ;;  %v804_v23 = vsub.f32 %v3698_v33, %v772_v43 }
 0x130   : > { %v898_v16 = vsub.f32 %v802_v60, %v1399_v45  ;;  %v994_v20 = vsel %vm962_vm8, %v896_v35, 0.0  ;;  %v1403_v59 = vpop.eup %1402  ;;  %vm578_vm10 = vcmp.lt.s32.totalorder %v3699_v10, 1000  ;;  %v934_v58 = vadd.s32 %v3612_v44, %v3700_v26 }
 0x131   : > { %vm964_vm11 = vcmp.lt.s32.totalorder %v932_v13, 1000  ;;  %v1024_v49 = vadd.f32 %v1023_v2, %v993_v53  ;;  %v805_v14 = vsub.f32 %v741_v52, %v773_v57  ;;  %v899_v62 = vsub.f32 %v803_v4, %v1401_v7 }
 0x132   : > { %v995_v34 = vsel %vm963_vm9, %v897_v1, 0.0  ;;  %v1405_v55 = vpop.eup %1404  ;;  %v640_v51 = vadd.f32 %v639_v9, %v609_v56  ;;  %v935_v63 = vadd.s32 %v3612_v44, %v3701_v37  ;;  %vm965_vm12 = vcmp.lt.s32.totalorder %v933_v61, 1000 }
 0x133   : > { %v1025_v46 = vadd.f32 %v1024_v49, %v994_v20  ;;  %v3705_v17 = vsub.f32 %v3703_v15, %v3704_v41  ;;  %v610_v31 = vsel %vm578_vm10, %v3706_v47, 0.0  ;;  %v900_v18 = vsub.f32 %v804_v23, %v1403_v59 }
 0x134   : > { %v996_v39 = vsel %vm964_vm11, %v898_v16, 0.0  ;;  %vm579_vm13 = vcmp.lt.s32.totalorder %v3707_v54, 1000  ;;  %vm966_vm14 = vcmp.lt.s32.totalorder %v934_v58, 1000  ;;  %v901_v29 = vsub.f32 %v805_v14, %v1405_v55 }
 0x135   : > { %v513_v5 = vsub.f32 %v3705_v17, %v3702_v12  ;;  %v1026_v24 = vadd.f32 %v1025_v46, %v995_v34  ;;  %v997_v3 = vsel %vm965_vm12, %v899_v62, 0.0  ;;  %v641_v42 = vadd.f32 %v640_v51, %v610_v31 }
 0x136   : > { %vm967_vm15 = vcmp.lt.s32.totalorder %v935_v63, 1000  ;;  %v998_v32 = vsel %vm966_vm14, %v900_v18, 0.0 }
 0x137   : > { %v1027_v44 = vadd.f32 %v1026_v24, %v996_v39  ;;  %v611_v0 = vsel %vm579_vm13, %v513_v5, 0.0  ;;  %v999_v48 = vsel %vm967_vm15, %v901_v29, 0.0 }
 0x138   : > { %v642_v19 = vadd.f32 %v641_v42, %v611_v0 }
 0x139   : > { %v1028_v11 = vadd.f32 %v1027_v44, %v997_v3 }
 0x13b   : > { %v1029_v36 = vadd.f32 %v1028_v11, %v998_v32 }
 0x13d   : > { %v1030_v28 = vadd.f32 %v1029_v36, %v999_v48 }
 0x13f   : > { %v1031_v8 = vadd.f32 %v1030_v28, %v642_v19 }
 0x141   : > { %v1032_v30 = vmul.f32 -0.5, %v1031_v8 }
 0x143   : > { %1033 = vst [vmem:[%s213_s3] sm:$0xff] %v1032_v30 }
 0x144   : > { %1475 = shalt.err (!%p1472_p10)
}
 0x145   : > { %s1476_s29 = scalar_lea.hbm %s3107_s14, 128  ;;  %s1480_s28 = scalar_lea.hbm %s3153_s2, 256 }
 0x146   : > { %p1477_p11 = scmp.ne.s32.totalorder %s3107_s14, %s1476_s29  ;;  %p1481_p13 = scmp.lt.u32.totalorder %s3107_s14, %s3153_s2 }
 0x147   : > { %p1482_p12 = scmp.lt.u32.totalorder %s1480_s28, %s1476_s29  ;;  %p1484_p6 = scmp.lt.u32.totalorder %s1476_s29, %s3107_s14 }
 0x148   : > { %p1478_p2 = pnand %p1477_p11, %p3708_p5 }
 0x149   : > { %p1483_p0 = por %p1482_p12, %p1481_p13 }
 0x14a   : > { %p1479_p8 = pneg %p1478_p2 }
 0x14b   : > { %p1485_p1 = por %p1484_p6, %p1483_p0 }
 0x14d   : > { %p1486_p3 = pnand %p1485_p1, %p1479_p8 }
 0x14f   : > { %1489 = shalt.err (!%p1486_p3)
}
 0x150   : > { %1235 = dma.vmem_to_hbm [thread:$0]  (%p3708_p5), %s3109_s4, 128, %s3107_s14, %s1035_s16  }
 0x151 PF: > { %s1060_s7 = sand.u32 1, %s1520_s9   ;;  %p3709_p4 = scmp.ne.s32.totalorder %s3296_s22, 0 }
 0x152   : > { %p3710_p7 = scmp.ge.s32.totalorder %s1532_s12, 2  ;;  %s1061_s20 = scalar_lea.sflag [#allocation4], %s1060_s7 }
 0x154   : > { %p1238_p9 = pnand %p3710_p7, %p3709_p4 }
 0x156   : > { %1515 = dma.done.wait (!%p1238_p9), %s1061_s20, 128  }
 0x157   : > { %1517 = vsyncadd (!%p1238_p9), %s1061_s20, 4294967168  ;;  %p18_p10 = scmp.ge.s32.totalorder %s1581_s15, 4   ;;  %s3711_s9 = smov %s1524_s10 }
 0x158   : > { %s3712_s10 = smov %s1528_s11  ;;  %s3713_s11 = smov %s1593_s18 }
 0x159   : > { %s3714_s12 = smov %s1581_s15  ;;  %20 = sbr.rel (!%p18_p10) target bundleno = 7 (0x7), region = 88 }
 0x160   :  { %1066 = vsyncpa [#allocation3], 1 }
 0x161   :  { %1068 = vsyncpa [#allocation3 + $0x1], 1 }
 0x162   :  { %1069 = vsyncpa [#allocation6], 1 }
 0x163   :  { %1071 = vsyncpa [#allocation6 + $0x1], 1 }
 0x164   :  { %1072 = vsyncpa [#allocation4], 1 }
 0x165   :  { %1074 = vsyncpa [#allocation4 + $0x1], 1 }

</bundles_post_ra>
